<compile_context>
chip_gen: v5e
topology: v5e:2x2
jax: 0.10.0
libtpu: 0.0.40
codegen_flags: <defaults>
</compile_context>

<pallas_src>
import functools

import jax
import jax.numpy as jnp
from jax.experimental import pallas as pl
from jax.experimental.pallas import tpu as pltpu


_LN_EPS = 1e-5
_MASK_NEG = -1e30


# ----------------------------------------------------------------------------
# Compiler params / tiling helpers
# ----------------------------------------------------------------------------

def _vmem_limit_bytes():
    """Per-generation scoped-VMEM budget (v7x: 64 MiB physical, v5e/v6e: 128 MiB)."""
    cap = 128 * 1024 * 1024
    try:
        cap = int(getattr(pltpu.get_tpu_info(), "vmem_capacity_bytes", cap))
    except Exception:
        pass
    if cap <= 64 * 1024 * 1024:
        return 40 * 1024 * 1024      # leave headroom for Mosaic scratch on v7x
    return 100 * 1024 * 1024         # use the big VMEM on v5e / v6e


@functools.lru_cache(maxsize=None)
def _cparams(dim_semantics):
    return pltpu.CompilerParams(
        dimension_semantics=tuple(dim_semantics),
        vmem_limit_bytes=_vmem_limit_bytes(),
    )


@functools.lru_cache(maxsize=None)
def _single_buffer_mode():
    """pl.Buffered(1) single-buffers grid-invariant operands (halves their VMEM).

    Probed once with a tiny kernel so we degrade gracefully if this JAX build
    rejects buffer_count=1 / pipeline_mode."""
    try:
        mode = pl.Buffered(1)

        def _copy(x_ref, o_ref):
            o_ref[...] = x_ref[...]

        x = jnp.zeros((8, 128), jnp.float32)
        out = pl.pallas_call(
            _copy,
            grid=(2,),
            in_specs=[pl.BlockSpec((8, 128), lambda i: (0, 0), pipeline_mode=mode)],
            out_specs=pl.BlockSpec((8, 128), lambda i: (0, 0)),
            out_shape=jax.ShapeDtypeStruct((8, 128), jnp.float32),
        )(x)
        jax.block_until_ready(out)
        return mode
    except Exception:
        return None


def _const_spec(block_shape, index_map):
    """BlockSpec for an operand whose block index never changes over the grid."""
    mode = _single_buffer_mode()
    if mode is None:
        return pl.BlockSpec(block_shape, index_map)
    return pl.BlockSpec(block_shape, index_map, pipeline_mode=mode)


def _round_up(x, m):
    return ((x + m - 1) // m) * m


def _pick_row_tile(m, cap=512):
    """Row tile: multiple of 8, >= 2 grid steps when m allows (pipelining +
    megacore split on v7x).  Returns (tile, grid, padded_rows)."""
    m8 = _round_up(max(m, 1), 8)
    tm = min(cap, m8)
    if tm == m8 and m8 > 8:
        tm = min(cap, _round_up(m8 // 2, 8))
    grid = -(-m8 // tm)
    return tm, grid, grid * tm


def _pick_f_tile(f, cap=1024):
    """Tile for the FFN hidden dim (reduction axis): full F when small, else the
    largest multiple-of-128 divisor <= cap (keeps (D,tf)/(tf,D) weights bounded)."""
    if f <= cap:
        return f
    for t in range(cap, 127, -128):
        if f % t == 0:
            return t
    return f   # TODO(synk): pad F for awkward non-divisible cases


def _pick_q_tile(lq, cap=128):
    if lq <= cap:
        return lq
    for t in range(cap, 7, -8):
        if lq % t == 0:
            return t
    return lq


def _pad_rows(x, m_pad):
    m = x.shape[0]
    if m == m_pad:
        return x
    return jnp.pad(x, ((0, m_pad - m), (0, 0)))


# ----------------------------------------------------------------------------
# Pallas kernels
# ----------------------------------------------------------------------------

def _layer_norm(z, g, b):
    mu = jnp.mean(z, axis=-1, keepdims=True)
    var = jnp.mean((z - mu) ** 2, axis=-1, keepdims=True)
    return (z - mu) * jax.lax.rsqrt(var + _LN_EPS) * g + b


def _linear_kernel(x_ref, w_ref, b_ref, o_ref):
    # o = x @ w + b ; bf16 MXU operands, f32 accumulation.
    x = x_ref[...].astype(jnp.bfloat16)
    y = jnp.dot(x, w_ref[...], preferred_element_type=jnp.float32) + b_ref[...]
    o_ref[...] = y.astype(o_ref.dtype)


def _qkv_kernel(x_ref, wq_ref, bq_ref, wk_ref, bk_ref, wv_ref, bv_ref,
                q_ref, k_ref, v_ref):
    # Fused Q/K/V projection: one activation read, three bf16 outputs.
    x = x_ref[...].astype(jnp.bfloat16)
    q_ref[...] = (jnp.dot(x, wq_ref[...], preferred_element_type=jnp.float32)
                  + bq_ref[...]).astype(q_ref.dtype)
    k_ref[...] = (jnp.dot(x, wk_ref[...], preferred_element_type=jnp.float32)
                  + bk_ref[...]).astype(k_ref.dtype)
    v_ref[...] = (jnp.dot(x, wv_ref[...], preferred_element_type=jnp.float32)
                  + bv_ref[...]).astype(v_ref.dtype)


def _kv_kernel(x_ref, wk_ref, bk_ref, wv_ref, bv_ref, k_ref, v_ref):
    # Fused K/V projection for cross-attention (encoder output read once).
    x = x_ref[...].astype(jnp.bfloat16)
    k_ref[...] = (jnp.dot(x, wk_ref[...], preferred_element_type=jnp.float32)
                  + bk_ref[...]).astype(k_ref.dtype)
    v_ref[...] = (jnp.dot(x, wv_ref[...], preferred_element_type=jnp.float32)
                  + bv_ref[...]).astype(v_ref.dtype)


def _proj_add_ln_kernel(x_ref, w_ref, b_ref, res_ref, g_ref, be_ref, o_ref):
    # Fused: output projection + residual add (dropout p=0) + LayerNorm.
    y = (jnp.dot(x_ref[...].astype(jnp.bfloat16), w_ref[...],
                 preferred_element_type=jnp.float32) + b_ref[...])
    z = res_ref[...] + y
    o_ref[...] = _layer_norm(z, g_ref[...], be_ref[...])


def _ffn_add_ln_kernel(x_ref, w1_ref, b1_ref, w2_ref, b2_ref, g_ref, be_ref,
                       o_ref, acc_ref):
    # Fused position-wise FFN (conv1x1 -> relu -> conv1x1) with the hidden dim
    # tiled on a reduction grid axis, + residual + LayerNorm in the finalize.
    f = pl.program_id(1)

    @pl.when(f == 0)
    def _():
        acc_ref[...] = jnp.zeros_like(acc_ref)

    x = x_ref[...]
    h = (jnp.dot(x.astype(jnp.bfloat16), w1_ref[...],
                 preferred_element_type=jnp.float32) + b1_ref[...])
    h = jnp.maximum(h, 0.0)
    acc_ref[...] += jnp.dot(h.astype(jnp.bfloat16), w2_ref[...],
                            preferred_element_type=jnp.float32)

    @pl.when(f == pl.num_programs(1) - 1)
    def _():
        z = x + acc_ref[...] + b2_ref[...]        # residual + conv2 bias (dropout p=0)
        o_ref[...] = _layer_norm(z, g_ref[...], be_ref[...])


def _attn_body(q, k, v, bias, scale, ctx_ref, attn_ref):
    # Scaled dot-product attention on a block of bmm slots.
    s = jnp.einsum("bqd,bkd->bqk", q, k,
                   preferred_element_type=jnp.float32) * scale
    if bias is not None:
        s = s + bias.astype(jnp.float32)          # additive -1e30 mask bias
    s_max = jnp.max(s, axis=-1, keepdims=True)
    p = jnp.exp(s - s_max)
    denom = jnp.sum(p, axis=-1, keepdims=True)
    attn = p * pl.reciprocal(denom, approx=True)  # EUP reciprocal, frees VALU
    attn_ref[...] = attn                          # returned attention weights (f32)
    ctx = jnp.einsum("bqk,bkd->bqd", attn.astype(jnp.bfloat16), v,
                     preferred_element_type=jnp.float32)
    ctx_ref[...] = ctx.astype(ctx_ref.dtype)


def _attn_kernel_masked(q_ref, k_ref, v_ref, bias_ref, ctx_ref, attn_ref, *, scale):
    _attn_body(q_ref[...], k_ref[...], v_ref[...], bias_ref[...], scale,
               ctx_ref, attn_ref)


def _attn_kernel_nomask(q_ref, k_ref, v_ref, ctx_ref, attn_ref, *, scale):
    _attn_body(q_ref[...], k_ref[...], v_ref[...], None, scale, ctx_ref, attn_ref)


# ----------------------------------------------------------------------------
# Pallas call wrappers
# ----------------------------------------------------------------------------

def linear(x2d, w, b, out_dtype=jnp.float32):
    """x2d (M,K) @ w (K,N) + b, tiled over (padded) M with a parallel grid axis."""
    M, K = x2d.shape
    N = w.shape[1]
    tm, gm, m_pad = _pick_row_tile(M)
    out = pl.pallas_call(
        _linear_kernel,
        grid=(gm,),
        in_specs=[
            pl.BlockSpec((tm, K), lambda i: (i, 0)),
            _const_spec((K, N), lambda i: (0, 0)),
            _const_spec((1, N), lambda i: (0, 0)),
        ],
        out_specs=pl.BlockSpec((tm, N), lambda i: (i, 0)),
        out_shape=jax.ShapeDtypeStruct((m_pad, N), out_dtype),
        compiler_params=_cparams(("parallel",)),
    )(_pad_rows(x2d, m_pad), w, b.reshape(1, N))
    return out[:M] if m_pad != M else out


def qkv_project(x2d, w_q, b_q, w_k, b_k, w_v, b_v):
    """Fused self-attention Q/K/V projection; three bf16 (M,D) outputs."""
    M, K = x2d.shape
    D = w_q.shape[1]
    tm, gm, m_pad = _pick_row_tile(M)
    q, k, v = pl.pallas_call(
        _qkv_kernel,
        grid=(gm,),
        in_specs=[
            pl.BlockSpec((tm, K), lambda i: (i, 0)),
            _const_spec((K, D), lambda i: (0, 0)),
            _const_spec((1, D), lambda i: (0, 0)),
            _const_spec((K, D), lambda i: (0, 0)),
            _const_spec((1, D), lambda i: (0, 0)),
            _const_spec((K, D), lambda i: (0, 0)),
            _const_spec((1, D), lambda i: (0, 0)),
        ],
        out_specs=[pl.BlockSpec((tm, D), lambda i: (i, 0))] * 3,
        out_shape=[jax.ShapeDtypeStruct((m_pad, D), jnp.bfloat16)] * 3,
        compiler_params=_cparams(("parallel",)),
    )(_pad_rows(x2d, m_pad), w_q, b_q.reshape(1, D), w_k, b_k.reshape(1, D),
      w_v, b_v.reshape(1, D))
    if m_pad != M:
        q, k, v = q[:M], k[:M], v[:M]
    return q, k, v


def kv_project(x2d, w_k, b_k, w_v, b_v):
    """Fused cross-attention K/V projection; two bf16 (M,D) outputs."""
    M, K = x2d.shape
    D = w_k.shape[1]
    tm, gm, m_pad = _pick_row_tile(M)
    k, v = pl.pallas_call(
        _kv_kernel,
        grid=(gm,),
        in_specs=[
            pl.BlockSpec((tm, K), lambda i: (i, 0)),
            _const_spec((K, D), lambda i: (0, 0)),
            _const_spec((1, D), lambda i: (0, 0)),
            _const_spec((K, D), lambda i: (0, 0)),
            _const_spec((1, D), lambda i: (0, 0)),
        ],
        out_specs=[pl.BlockSpec((tm, D), lambda i: (i, 0))] * 2,
        out_shape=[jax.ShapeDtypeStruct((m_pad, D), jnp.bfloat16)] * 2,
        compiler_params=_cparams(("parallel",)),
    )(_pad_rows(x2d, m_pad), w_k, b_k.reshape(1, D), w_v, b_v.reshape(1, D))
    if m_pad != M:
        k, v = k[:M], v[:M]
    return k, v


def proj_add_ln(ctx2d, w_o, b_o, res2d, gamma, beta):
    """Fused out-projection + residual + LayerNorm, tiled over (padded) M."""
    M, K = ctx2d.shape
    N = w_o.shape[1]
    tm, gm, m_pad = _pick_row_tile(M)
    out = pl.pallas_call(
        _proj_add_ln_kernel,
        grid=(gm,),
        in_specs=[
            pl.BlockSpec((tm, K), lambda i: (i, 0)),
            _const_spec((K, N), lambda i: (0, 0)),
            _const_spec((1, N), lambda i: (0, 0)),
            pl.BlockSpec((tm, N), lambda i: (i, 0)),
            _const_spec((1, N), lambda i: (0, 0)),
            _const_spec((1, N), lambda i: (0, 0)),
        ],
        out_specs=pl.BlockSpec((tm, N), lambda i: (i, 0)),
        out_shape=jax.ShapeDtypeStruct((m_pad, N), jnp.float32),
        compiler_params=_cparams(("parallel",)),
    )(_pad_rows(ctx2d, m_pad), w_o, b_o.reshape(1, N), _pad_rows(res2d, m_pad),
      gamma.reshape(1, N), beta.reshape(1, N))
    return out[:M] if m_pad != M else out


def ffn_add_ln(x2d, w1, b1, w2, b2, gamma, beta):
    """Fused FFN + residual + LayerNorm; hidden dim F tiled on a reduction axis."""
    M, D = x2d.shape
    F = w1.shape[1]
    tm, gm, m_pad = _pick_row_tile(M)
    tf = _pick_f_tile(F)
    gf = F // tf
    out = pl.pallas_call(
        _ffn_add_ln_kernel,
        grid=(gm, gf),
        in_specs=[
            pl.BlockSpec((tm, D), lambda i, f: (i, 0)),
            pl.BlockSpec((D, tf), lambda i, f: (0, f)),
            pl.BlockSpec((1, tf), lambda i, f: (0, f)),
            pl.BlockSpec((tf, D), lambda i, f: (f, 0)),
            _const_spec((1, D), lambda i, f: (0, 0)),
            _const_spec((1, D), lambda i, f: (0, 0)),
            _const_spec((1, D), lambda i, f: (0, 0)),
        ],
        out_specs=pl.BlockSpec((tm, D), lambda i, f: (i, 0)),
        out_shape=jax.ShapeDtypeStruct((m_pad, D), jnp.float32),
        scratch_shapes=[pltpu.VMEM((tm, D), jnp.float32)],
        compiler_params=_cparams(("parallel", "arbitrary")),
    )(_pad_rows(x2d, m_pad), w1, b1.reshape(1, F), w2, b2.reshape(1, D),
      gamma.reshape(1, D), beta.reshape(1, D))
    return out[:M] if m_pad != M else out


def attention_core(q_r, k_r, v_r, bias, scale, batch):
    """Scaled-dot-product attention over B*H bmm slots (reference's head-less
    .view layout).  Each grid step handles `batch` consecutive slots, so slot
    i uses bias[i % B] -- exactly PyTorch's attn_mask.repeat(num_heads, 1, 1)
    pairing, without replicating the mask H times in HBM."""
    BH, Lq, dh = q_r.shape
    Lk = k_r.shape[1]
    H = BH // batch
    tq = _pick_q_tile(Lq)
    gq = Lq // tq
    if bias is None:
        kern = functools.partial(_attn_kernel_nomask, scale=scale)
        in_specs = [
            pl.BlockSpec((batch, tq, dh), lambda j, qi: (j, qi, 0)),
            pl.BlockSpec((batch, Lk, dh), lambda j, qi: (j, 0, 0)),
            pl.BlockSpec((batch, Lk, dh), lambda j, qi: (j, 0, 0)),
        ]
        operands = (q_r, k_r, v_r)
    else:
        kern = functools.partial(_attn_kernel_masked, scale=scale)
        in_specs = [
            pl.BlockSpec((batch, tq, dh), lambda j, qi: (j, qi, 0)),
            pl.BlockSpec((batch, Lk, dh), lambda j, qi: (j, 0, 0)),
            pl.BlockSpec((batch, Lk, dh), lambda j, qi: (j, 0, 0)),
            pl.BlockSpec((batch, tq, Lk), lambda j, qi: (0, qi, 0)),
        ]
        operands = (q_r, k_r, v_r, bias)
    ctx, attn = pl.pallas_call(
        kern,
        grid=(H, gq),
        in_specs=in_specs,
        out_specs=[
            pl.BlockSpec((batch, tq, dh), lambda j, qi: (j, qi, 0)),
            pl.BlockSpec((batch, tq, Lk), lambda j, qi: (j, qi, 0)),
        ],
        out_shape=[
            jax.ShapeDtypeStruct((BH, Lq, dh), jnp.bfloat16),
            jax.ShapeDtypeStruct((BH, Lq, Lk), jnp.float32),
        ],
        compiler_params=_cparams(("parallel", "parallel")),
    )(*operands)
    return ctx, attn


# ----------------------------------------------------------------------------
# Module-level forward functions (faithful to the PyTorch reference)
# ----------------------------------------------------------------------------

def multi_head_attention(p, num_heads, key, value, query, attn_mask):
    """MultiHeadAttention.forward(key, value, query, attention_mask)."""
    B, Lq, D = query.shape
    dh = D // num_heads
    residual = query.reshape(-1, D)

    if key is query and value is query:
        # Self-attention: one fused Q/K/V projection.
        q2, k2, v2 = qkv_project(query.reshape(-1, D),
                                 p["w_q"], p["b_q"], p["w_k"], p["b_k"],
                                 p["w_v"], p["b_v"])
    else:
        # Cross-attention: Q from the decoder stream, fused K/V from the encoder.
        q2 = linear(query.reshape(-1, D), p["w_q"], p["b_q"],
                    out_dtype=jnp.bfloat16)
        if key is value:
            k2, v2 = kv_project(key.reshape(-1, D), p["w_k"], p["b_k"],
                                p["w_v"], p["b_v"])
        else:
            k2 = linear(key.reshape(-1, D), p["w_k"], p["b_k"],
                        out_dtype=jnp.bfloat16)
            v2 = linear(value.reshape(-1, D), p["w_v"], p["b_v"],
                        out_dtype=jnp.bfloat16)

    # Faithful reproduction of the PyTorch raw .view(B*H, -1, dh) semantics
    # (no head transpose -- intentionally matches the reference).
    q_r = q2.reshape(B * num_heads, -1, dh)
    k_r = k2.reshape(B * num_heads, -1, dh)
    v_r = v2.reshape(B * num_heads, -1, dh)

    scale = float(dh) ** -0.5
    bias = None
    if attn_mask is not None:
        # bf16 additive bias: half the mask DMA/VMEM of f32 and no in-kernel select.
        bias = jnp.where(attn_mask.astype(bool), _MASK_NEG, 0.0).astype(jnp.bfloat16)
    ctx, attn = attention_core(q_r, k_r, v_r, bias, scale, B)

    ctx2 = ctx.reshape(-1, D)   # == context.view(batch, -1, dh*H), flattened rows
    # Fused: output projection + dropout(identity) + residual + LayerNorm.
    out = proj_add_ln(ctx2, p["w_o"], p["b_o"], residual, p["ln_g"], p["ln_b"])
    return out.reshape(B, Lq, D), attn


def feed_forward(p, x):
    """PositionalWiseFeedForward.forward(x): Conv1d(k=1) as matmuls, fused with
    the residual add + LayerNorm epilogue."""
    B, L, D = x.shape
    out = ffn_add_ln(x.reshape(-1, D), p["w1"], p["b1"], p["w2"], p["b2"],
                     p["ln_g"], p["ln_b"])
    return out.reshape(B, L, D)


def padding_mask(seq_k, seq_q):
    len_q = seq_q.shape[1]
    pad = (seq_k == 0)                               # (B, Lk)
    return jnp.broadcast_to(pad[:, None, :], (seq_k.shape[0], len_q, seq_k.shape[1]))


def sequence_mask(seq):
    B, L = seq.shape
    m = jnp.triu(jnp.ones((L, L), jnp.uint8), k=1)
    return jnp.broadcast_to(m[None], (B, L, L))


def positional_encoding(pos_table, inputs_len, seq_len):
    # input_pos = [[1..len] + [0]*(max_len-len)]; row 0 of the table is zeros.
    pos_idx = jnp.arange(1, seq_len + 1)[None, :]                  # (1, L)
    input_pos = jnp.where(pos_idx <= inputs_len[:, None], pos_idx, 0)
    return pos_table[input_pos]                                    # (B, L, D)


def decoder_forward(params, inputs, inputs_len, enc_output,
                    context_attn_mask=None, *, num_heads):
    B, L = inputs.shape
    # Glue: embedding + positional encoding gathers stay in plain JAX.
    output = params["seq_emb"][inputs]                             # seq_embedding
    output = output + positional_encoding(params["pos_emb"], inputs_len, L)

    self_pad = padding_mask(inputs, inputs).astype(jnp.int32)
    seq_m = sequence_mask(inputs).astype(jnp.int32)
    self_attn_mask = (self_pad + seq_m) > 0                        # torch.gt(..., 0)

    self_attentions, context_attentions = [], []
    for layer in params["layers"]:
        # NOTE: the reference DecoderLayer re-uses the SAME attention module
        # for both self- and context-attention; we reproduce that.
        output, self_attn = multi_head_attention(
            layer["attn"], num_heads, output, output, output, self_attn_mask)
        output, ctx_attn = multi_head_attention(
            layer["attn"], num_heads, enc_output, enc_output, output,
            context_attn_mask)
        output = feed_forward(layer["ffn"], output)
        self_attentions.append(self_attn)
        context_attentions.append(ctx_attn)
    return output, self_attentions, context_attentions


# ----------------------------------------------------------------------------
# Deterministic parameter init (weights pre-transposed + bf16-cast once)
# ----------------------------------------------------------------------------

def _make_pos_table(max_seq_len, d_model):
    j = jnp.arange(d_model)
    pos = jnp.arange(max_seq_len)[:, None].astype(jnp.float32)
    angle = pos / jnp.power(10000.0, 2.0 * (j // 2).astype(jnp.float32) / d_model)
    pe = jnp.where(j % 2 == 0, jnp.sin(angle), jnp.cos(angle))
    return jnp.concatenate([jnp.zeros((1, d_model), jnp.float32),
                            pe.astype(jnp.float32)], 0)


def _init_linear(key, out_dim, in_dim):
    kw, kb = jax.random.split(key)
    w = jax.random.normal(kw, (out_dim, in_dim), jnp.float32) * 0.05
    b = jax.random.normal(kb, (out_dim,), jnp.float32) * 0.01
    return w, b


def init_decoder_params(key, vocab_size, max_seq_len, num_layers,
                        model_dim, num_heads, ffn_dim):
    del num_heads  # carried as a static argument of decoder_forward
    keys = jax.random.split(key, num_layers + 1)
    emb = jax.random.normal(keys[0], (vocab_size + 1, model_dim), jnp.float32) * 0.1
    emb = emb.at[0].set(0.0)  # padding_idx=0
    layers = []
    for li in range(num_layers):
        lk = jax.random.split(keys[li + 1], 6)
        wq, bq = _init_linear(lk[0], model_dim, model_dim)
        wk, bk = _init_linear(lk[1], model_dim, model_dim)
        wv, bv = _init_linear(lk[2], model_dim, model_dim)
        wo, bo = _init_linear(lk[3], model_dim, model_dim)
        # Pre-transpose to (in, out) and cast to bf16 ONCE (MXU-native operand,
        # half the weight DMA / resident VMEM). Biases / LN params stay f32.
        attn = dict(
            w_q=wq.T.astype(jnp.bfloat16), b_q=bq,
            w_k=wk.T.astype(jnp.bfloat16), b_k=bk,
            w_v=wv.T.astype(jnp.bfloat16), b_v=bv,
            w_o=wo.T.astype(jnp.bfloat16), b_o=bo,
            ln_g=jnp.ones((model_dim,), jnp.float32),
            ln_b=jnp.zeros((model_dim,), jnp.float32))
        w1, b1 = _init_linear(lk[4], ffn_dim, model_dim)
        w2, b2 = _init_linear(lk[5], model_dim, ffn_dim)
        ffn = dict(w1=w1.T.astype(jnp.bfloat16), b1=b1,                # (D,F)
                   w2=w2.T.astype(jnp.bfloat16), b2=b2,                # (F,D)
                   ln_g=jnp.ones((model_dim,), jnp.float32),
                   ln_b=jnp.zeros((model_dim,), jnp.float32))
        layers.append(dict(attn=attn, ffn=ffn))
    return dict(seq_emb=emb, pos_emb=_make_pos_table(max_seq_len, model_dim),
                layers=layers)


# ----------------------------------------------------------------------------
# Demo
# ----------------------------------------------------------------------------

if __name__ == "__main__":
    vocab_size, max_seq_len = 20, 16
    num_layers, model_dim, num_heads, ffn_dim = 2, 32, 4, 64
    B, L, L_enc = 2, 8, 8

    root = jax.random.PRNGKey(0)
    kp, ki, ke = jax.random.split(root, 3)

    params = init_decoder_params(kp, vocab_size, max_seq_len, num_layers,
                                 model_dim, num_heads, ffn_dim)

    inputs = jax.random.randint(ki, (B, L), 1, vocab_size + 1, dtype=jnp.int32)
    inputs = inputs.at[1, 6:].set(0)                    # padding in 2nd sequence
    inputs_len = jnp.array([8, 6], dtype=jnp.int32)     # max == L (as in reference use)
    enc_output = jax.random.normal(ke, (B, L_enc, model_dim), jnp.float32)

    _single_buffer_mode()   # probe Buffered(1) support once, outside the jit trace

    fwd = jax.jit(functools.partial(decoder_forward, num_heads=num_heads))
    out, self_attns, ctx_attns = fwd(params, inputs, inputs_len, enc_output)

    jax.block_until_ready((out, self_attns, ctx_attns))
    assert out.shape == (B, L, model_dim)
    assert out.dtype == jnp.float32
    assert len(self_attns) == num_layers and len(ctx_attns) == num_layers
    assert self_attns[0].shape == (B * num_heads, L, L)
    assert ctx_attns[0].shape == (B * num_heads, L, L_enc)
    assert not bool(jnp.any(jnp.isnan(out)))
    print("KERNEL_OK")
</pallas_src>

<mosaic_0001>
module attributes {stable_mosaic.version = 11 : i64} {
  func.func @_copy(%arg0: i32, %arg1: memref<8x128xf32, #tpu.memory_space<vmem>>, %arg2: memref<8x128xf32, #tpu.memory_space<vmem>>) attributes {dimension_semantics = [#tpu.dimension_semantics<arbitrary>], iteration_bounds = array<i64: 2>, scalar_prefetch = 0 : i64, scratch_operands = 0 : i64, tpu.core_type = #tpu.core_type<tc>, window_params = [{pipeline_mode = #tpu.pipeline_mode<synchronous>, transform_indices = @transform_0, window_bounds = array<i64: 8, 128>}, {pipeline_mode = #tpu.pipeline_mode<synchronous>, transform_indices = @transform_1, window_bounds = array<i64: 8, 128>}]} {
    %c0 = arith.constant 0 : index
    %c0_0 = arith.constant 0 : index
    %0 = vector.load %arg1[%c0, %c0_0] : memref<8x128xf32, #tpu.memory_space<vmem>>, vector<8x128xf32>
    %c0_1 = arith.constant 0 : index
    %c0_2 = arith.constant 0 : index
    %1 = vector.load %arg2[%c0_1, %c0_2] : memref<8x128xf32, #tpu.memory_space<vmem>>, vector<8x128xf32>
    tpu.vector_store %arg2[%c0_1, %c0_2], %0 {strides = array<i32>} : memref<8x128xf32, #tpu.memory_space<vmem>>, vector<8x128xf32>,
    return
  }
  func.func @transform_0(%arg0: i32) -> (i32, i32) {
    %c0_i32 = arith.constant 0 : i32
    %c0_i32_0 = arith.constant 0 : i32
    %c0_i32_1 = arith.constant 0 : i32
    return %c0_i32, %c0_i32_0 : i32, i32
  }
  func.func @transform_1(%arg0: i32) -> (i32, i32) {
    %c0_i32 = arith.constant 0 : i32
    %c0_i32_0 = arith.constant 0 : i32
    %c0_i32_1 = arith.constant 0 : i32
    return %c0_i32, %c0_i32_0 : i32, i32
  }
}

module attributes {stable_mosaic.version = 11 : i64} {
  func.func @_qkv_kernel(%arg0: i32, %arg1: memref<8x32xf32, #tpu.memory_space<vmem>>, %arg2: memref<32x32xbf16, #tpu.memory_space<vmem>>, %arg3: memref<1x32xf32, #tpu.memory_space<vmem>>, %arg4: memref<32x32xbf16, #tpu.memory_space<vmem>>, %arg5: memref<1x32xf32, #tpu.memory_space<vmem>>, %arg6: memref<32x32xbf16, #tpu.memory_space<vmem>>, %arg7: memref<1x32xf32, #tpu.memory_space<vmem>>, %arg8: memref<8x32xbf16, #tpu.memory_space<vmem>>, %arg9: memref<8x32xbf16, #tpu.memory_space<vmem>>, %arg10: memref<8x32xbf16, #tpu.memory_space<vmem>>) attributes {dimension_semantics = [#tpu.dimension_semantics<parallel>], iteration_bounds = array<i64: 2>, scalar_prefetch = 0 : i64, scratch_operands = 0 : i64, tpu.core_type = #tpu.core_type<tc>, window_params = [{transform_indices = @transform_0, window_bounds = array<i64: 8, 32>}, {pipeline_mode = #tpu.pipeline_mode<synchronous>, transform_indices = @transform_1, window_bounds = array<i64: 32, 32>}, {pipeline_mode = #tpu.pipeline_mode<synchronous>, transform_indices = @transform_2, window_bounds = array<i64: 1, 32>}, {pipeline_mode = #tpu.pipeline_mode<synchronous>, transform_indices = @transform_3, window_bounds = array<i64: 32, 32>}, {pipeline_mode = #tpu.pipeline_mode<synchronous>, transform_indices = @transform_4, window_bounds = array<i64: 1, 32>}, {pipeline_mode = #tpu.pipeline_mode<synchronous>, transform_indices = @transform_5, window_bounds = array<i64: 32, 32>}, {pipeline_mode = #tpu.pipeline_mode<synchronous>, transform_indices = @transform_6, window_bounds = array<i64: 1, 32>}, {transform_indices = @transform_7, window_bounds = array<i64: 8, 32>}, {transform_indices = @transform_8, window_bounds = array<i64: 8, 32>}, {transform_indices = @transform_9, window_bounds = array<i64: 8, 32>}]} {
    %c0 = arith.constant 0 : index
    %c0_0 = arith.constant 0 : index
    %0 = vector.load %arg1[%c0, %c0_0] : memref<8x32xf32, #tpu.memory_space<vmem>>, vector<8x32xf32>
    %1 = arith.truncf %0 : vector<8x32xf32> to vector<8x32xbf16>
    %c0_1 = arith.constant 0 : index
    %c0_2 = arith.constant 0 : index
    %2 = vector.load %arg2[%c0_1, %c0_2] : memref<32x32xbf16, #tpu.memory_space<vmem>>, vector<32x32xbf16>
    %cst = arith.constant dense<0.000000e+00> : vector<8x32xf32>
    %3 = tpu.matmul %1, %2, %cst {dimension_numbers = #tpu.dot_dimension_numbers<[1], [0], [0], [1], [0, 0, 1, 1], [], []>} : vector<8x32xbf16>, vector<32x32xbf16>, vector<8x32xf32> -> vector<8x32xf32>
    %c0_3 = arith.constant 0 : index
    %c0_4 = arith.constant 0 : index
    %4 = vector.load %arg3[%c0_3, %c0_4] : memref<1x32xf32, #tpu.memory_space<vmem>>, vector<1x32xf32>
    %5 = vector.broadcast %4 : vector<1x32xf32> to vector<8x32xf32>
    %6 = arith.addf %3, %5 : vector<8x32xf32>
    %7 = arith.truncf %6 : vector<8x32xf32> to vector<8x32xbf16>
    %c0_5 = arith.constant 0 : index
    %c0_6 = arith.constant 0 : index
    %8 = vector.load %arg8[%c0_5, %c0_6] : memref<8x32xbf16, #tpu.memory_space<vmem>>, vector<8x32xbf16>
    tpu.vector_store %arg8[%c0_5, %c0_6], %7 {strides = array<i32>} : memref<8x32xbf16, #tpu.memory_space<vmem>>, vector<8x32xbf16>,
    %c0_7 = arith.constant 0 : index
    %c0_8 = arith.constant 0 : index
    %9 = vector.load %arg4[%c0_7, %c0_8] : memref<32x32xbf16, #tpu.memory_space<vmem>>, vector<32x32xbf16>
    %cst_9 = arith.constant dense<0.000000e+00> : vector<8x32xf32>
    %10 = tpu.matmul %1, %9, %cst_9 {dimension_numbers = #tpu.dot_dimension_numbers<[1], [0], [0], [1], [0, 0, 1, 1], [], []>} : vector<8x32xbf16>, vector<32x32xbf16>, vector<8x32xf32> -> vector<8x32xf32>
    %c0_10 = arith.constant 0 : index
    %c0_11 = arith.constant 0 : index
    %11 = vector.load %arg5[%c0_10, %c0_11] : memref<1x32xf32, #tpu.memory_space<vmem>>, vector<1x32xf32>
    %12 = vector.broadcast %11 : vector<1x32xf32> to vector<8x32xf32>
    %13 = arith.addf %10, %12 : vector<8x32xf32>
    %14 = arith.truncf %13 : vector<8x32xf32> to vector<8x32xbf16>
    %c0_12 = arith.constant 0 : index
    %c0_13 = arith.constant 0 : index
    %15 = vector.load %arg9[%c0_12, %c0_13] : memref<8x32xbf16, #tpu.memory_space<vmem>>, vector<8x32xbf16>
    tpu.vector_store %arg9[%c0_12, %c0_13], %14 {strides = array<i32>} : memref<8x32xbf16, #tpu.memory_space<vmem>>, vector<8x32xbf16>,
    %c0_14 = arith.constant 0 : index
    %c0_15 = arith.constant 0 : index
    %16 = vector.load %arg6[%c0_14, %c0_15] : memref<32x32xbf16, #tpu.memory_space<vmem>>, vector<32x32xbf16>
    %cst_16 = arith.constant dense<0.000000e+00> : vector<8x32xf32>
    %17 = tpu.matmul %1, %16, %cst_16 {dimension_numbers = #tpu.dot_dimension_numbers<[1], [0], [0], [1], [0, 0, 1, 1], [], []>} : vector<8x32xbf16>, vector<32x32xbf16>, vector<8x32xf32> -> vector<8x32xf32>
    %c0_17 = arith.constant 0 : index
    %c0_18 = arith.constant 0 : index
    %18 = vector.load %arg7[%c0_17, %c0_18] : memref<1x32xf32, #tpu.memory_space<vmem>>, vector<1x32xf32>
    %19 = vector.broadcast %18 : vector<1x32xf32> to vector<8x32xf32>
    %20 = arith.addf %17, %19 : vector<8x32xf32>
    %21 = arith.truncf %20 : vector<8x32xf32> to vector<8x32xbf16>
    %c0_19 = arith.constant 0 : index
    %c0_20 = arith.constant 0 : index
    %22 = vector.load %arg10[%c0_19, %c0_20] : memref<8x32xbf16, #tpu.memory_space<vmem>>, vector<8x32xbf16>
    tpu.vector_store %arg10[%c0_19, %c0_20], %21 {strides = array<i32>} : memref<8x32xbf16, #tpu.memory_space<vmem>>, vector<8x32xbf16>,
    return
  }
  func.func @transform_0(%arg0: i32) -> (i32, i32) {
    %c0_i32 = arith.constant 0 : i32
    %c0_i32_0 = arith.constant 0 : i32
    return %arg0, %c0_i32 : i32, i32
  }
  func.func @transform_1(%arg0: i32) -> (i32, i32) {
    %c0_i32 = arith.constant 0 : i32
    %c0_i32_0 = arith.constant 0 : i32
    %c0_i32_1 = arith.constant 0 : i32
    return %c0_i32, %c0_i32_0 : i32, i32
  }
  func.func @transform_2(%arg0: i32) -> (i32, i32) {
    %c0_i32 = arith.constant 0 : i32
    %c0_i32_0 = arith.constant 0 : i32
    %c0_i32_1 = arith.constant 0 : i32
    return %c0_i32, %c0_i32_0 : i32, i32
  }
  func.func @transform_3(%arg0: i32) -> (i32, i32) {
    %c0_i32 = arith.constant 0 : i32
    %c0_i32_0 = arith.constant 0 : i32
    %c0_i32_1 = arith.constant 0 : i32
    return %c0_i32, %c0_i32_0 : i32, i32
  }
  func.func @transform_4(%arg0: i32) -> (i32, i32) {
    %c0_i32 = arith.constant 0 : i32
    %c0_i32_0 = arith.constant 0 : i32
    %c0_i32_1 = arith.constant 0 : i32
    return %c0_i32, %c0_i32_0 : i32, i32
  }
  func.func @transform_5(%arg0: i32) -> (i32, i32) {
    %c0_i32 = arith.constant 0 : i32
    %c0_i32_0 = arith.constant 0 : i32
    %c0_i32_1 = arith.constant 0 : i32
    return %c0_i32, %c0_i32_0 : i32, i32
  }
  func.func @transform_6(%arg0: i32) -> (i32, i32) {
    %c0_i32 = arith.constant 0 : i32
    %c0_i32_0 = arith.constant 0 : i32
    %c0_i32_1 = arith.constant 0 : i32
    return %c0_i32, %c0_i32_0 : i32, i32
  }
  func.func @transform_7(%arg0: i32) -> (i32, i32) {
    %c0_i32 = arith.constant 0 : i32
    %c0_i32_0 = arith.constant 0 : i32
    return %arg0, %c0_i32 : i32, i32
  }
  func.func @transform_8(%arg0: i32) -> (i32, i32) {
    %c0_i32 = arith.constant 0 : i32
    %c0_i32_0 = arith.constant 0 : i32
    return %arg0, %c0_i32 : i32, i32
  }
  func.func @transform_9(%arg0: i32) -> (i32, i32) {
    %c0_i32 = arith.constant 0 : i32
    %c0_i32_0 = arith.constant 0 : i32
    return %arg0, %c0_i32 : i32, i32
  }
}

module attributes {stable_mosaic.version = 11 : i64} {
  func.func @_attn_kernel_masked(%arg0: i32, %arg1: i32, %arg2: memref<2x8x8xbf16, #tpu.memory_space<vmem>>, %arg3: memref<2x8x8xbf16, #tpu.memory_space<vmem>>, %arg4: memref<2x8x8xbf16, #tpu.memory_space<vmem>>, %arg5: memref<2x8x8xbf16, #tpu.memory_space<vmem>>, %arg6: memref<2x8x8xbf16, #tpu.memory_space<vmem>>, %arg7: memref<2x8x8xf32, #tpu.memory_space<vmem>>) attributes {dimension_semantics = [#tpu.dimension_semantics<parallel>, #tpu.dimension_semantics<parallel>], iteration_bounds = array<i64: 4, 1>, scalar_prefetch = 0 : i64, scratch_operands = 0 : i64, tpu.core_type = #tpu.core_type<tc>, window_params = [{transform_indices = @transform_0, window_bounds = array<i64: 2, 8, 8>}, {transform_indices = @transform_1, window_bounds = array<i64: 2, 8, 8>}, {transform_indices = @transform_2, window_bounds = array<i64: 2, 8, 8>}, {transform_indices = @transform_3, window_bounds = array<i64: 2, 8, 8>}, {transform_indices = @transform_4, window_bounds = array<i64: 2, 8, 8>}, {transform_indices = @transform_5, window_bounds = array<i64: 2, 8, 8>}]} {
    %c0 = arith.constant 0 : index
    %c0_0 = arith.constant 0 : index
    %c0_1 = arith.constant 0 : index
    %0 = vector.load %arg2[%c0, %c0_0, %c0_1] : memref<2x8x8xbf16, #tpu.memory_space<vmem>>, vector<2x8x8xbf16>
    %c0_2 = arith.constant 0 : index
    %c0_3 = arith.constant 0 : index
    %c0_4 = arith.constant 0 : index
    %1 = vector.load %arg3[%c0_2, %c0_3, %c0_4] : memref<2x8x8xbf16, #tpu.memory_space<vmem>>, vector<2x8x8xbf16>
    %c0_5 = arith.constant 0 : index
    %c0_6 = arith.constant 0 : index
    %c0_7 = arith.constant 0 : index
    %2 = vector.load %arg4[%c0_5, %c0_6, %c0_7] : memref<2x8x8xbf16, #tpu.memory_space<vmem>>, vector<2x8x8xbf16>
    %c0_8 = arith.constant 0 : index
    %c0_9 = arith.constant 0 : index
    %c0_10 = arith.constant 0 : index
    %3 = vector.load %arg5[%c0_8, %c0_9, %c0_10] : memref<2x8x8xbf16, #tpu.memory_space<vmem>>, vector<2x8x8xbf16>
    "tpu.trace_start"() <{level = 10 : i32, message = "bqd,bkd->bqk"}> : () -> ()
    %cst = arith.constant dense<0.000000e+00> : vector<2x8x8xf32>
    %4 = tpu.matmul %0, %1, %cst {dimension_numbers = #tpu.dot_dimension_numbers<[2], [2], [1], [1], [0, 0, 0, 1, 1, 1], [0], [0]>} : vector<2x8x8xbf16>, vector<2x8x8xbf16>, vector<2x8x8xf32> -> vector<2x8x8xf32>
    "tpu.trace_stop"() : () -> ()
    %cst_11 = arith.constant 0.353553385 : f32
    %5 = vector.broadcast %cst_11 : f32 to vector<2x8x8xf32>
    %6 = arith.mulf %4, %5 : vector<2x8x8xf32>
    %7 = arith.extf %3 : vector<2x8x8xbf16> to vector<2x8x8xf32>
    %8 = arith.addf %6, %7 : vector<2x8x8xf32>
    %cst_12 = arith.constant dense<0xFF800000> : vector<2x8xf32>
    %9 = vector.multi_reduction <maximumf>, %8, %cst_12 [2] : vector<2x8x8xf32> to vector<2x8xf32>
    %10 = vector.shape_cast %9 : vector<2x8xf32> to vector<2x8x1xf32>
    %11 = vector.broadcast %10 : vector<2x8x1xf32> to vector<2x8x8xf32>
    %12 = arith.subf %8, %11 : vector<2x8x8xf32>
    %13 = math.exp %12 : vector<2x8x8xf32>
    %cst_13 = arith.constant dense<0.000000e+00> : vector<2x8xf32>
    %14 = vector.multi_reduction <add>, %13, %cst_13 [2] : vector<2x8x8xf32> to vector<2x8xf32>
    %15 = vector.shape_cast %14 : vector<2x8xf32> to vector<2x8x1xf32>
    %16 = tpu.reciprocal %15 {approx = true} : vector<2x8x1xf32> -> vector<2x8x1xf32>
    %17 = vector.broadcast %16 : vector<2x8x1xf32> to vector<2x8x8xf32>
    %18 = arith.mulf %13, %17 : vector<2x8x8xf32>
    %c0_14 = arith.constant 0 : index
    %c0_15 = arith.constant 0 : index
    %c0_16 = arith.constant 0 : index
    %19 = vector.load %arg7[%c0_14, %c0_15, %c0_16] : memref<2x8x8xf32, #tpu.memory_space<vmem>>, vector<2x8x8xf32>
    tpu.vector_store %arg7[%c0_14, %c0_15, %c0_16], %18 {strides = array<i32>} : memref<2x8x8xf32, #tpu.memory_space<vmem>>, vector<2x8x8xf32>,
    %20 = arith.truncf %18 : vector<2x8x8xf32> to vector<2x8x8xbf16>
    "tpu.trace_start"() <{level = 10 : i32, message = "bqk,bkd->bqd"}> : () -> ()
    %cst_17 = arith.constant dense<0.000000e+00> : vector<2x8x8xf32>
    %21 = tpu.matmul %20, %2, %cst_17 {dimension_numbers = #tpu.dot_dimension_numbers<[2], [1], [1], [2], [0, 0, 0, 1, 1, 2], [0], [0]>} : vector<2x8x8xbf16>, vector<2x8x8xbf16>, vector<2x8x8xf32> -> vector<2x8x8xf32>
    "tpu.trace_stop"() : () -> ()
    %22 = arith.truncf %21 : vector<2x8x8xf32> to vector<2x8x8xbf16>
    %c0_18 = arith.constant 0 : index
    %c0_19 = arith.constant 0 : index
    %c0_20 = arith.constant 0 : index
    %23 = vector.load %arg6[%c0_18, %c0_19, %c0_20] : memref<2x8x8xbf16, #tpu.memory_space<vmem>>, vector<2x8x8xbf16>
    tpu.vector_store %arg6[%c0_18, %c0_19, %c0_20], %22 {strides = array<i32>} : memref<2x8x8xbf16, #tpu.memory_space<vmem>>, vector<2x8x8xbf16>,
    return
  }
  func.func @transform_0(%arg0: i32, %arg1: i32) -> (i32, i32, i32) {
    %c0_i32 = arith.constant 0 : i32
    %c0_i32_0 = arith.constant 0 : i32
    return %arg0, %arg1, %c0_i32 : i32, i32, i32
  }
  func.func @transform_1(%arg0: i32, %arg1: i32) -> (i32, i32, i32) {
    %c0_i32 = arith.constant 0 : i32
    %c0_i32_0 = arith.constant 0 : i32
    %c0_i32_1 = arith.constant 0 : i32
    return %arg0, %c0_i32, %c0_i32_0 : i32, i32, i32
  }
  func.func @transform_2(%arg0: i32, %arg1: i32) -> (i32, i32, i32) {
    %c0_i32 = arith.constant 0 : i32
    %c0_i32_0 = arith.constant 0 : i32
    %c0_i32_1 = arith.constant 0 : i32
    return %arg0, %c0_i32, %c0_i32_0 : i32, i32, i32
  }
  func.func @transform_3(%arg0: i32, %arg1: i32) -> (i32, i32, i32) {
    %c0_i32 = arith.constant 0 : i32
    %c0_i32_0 = arith.constant 0 : i32
    %c0_i32_1 = arith.constant 0 : i32
    return %c0_i32, %arg1, %c0_i32_0 : i32, i32, i32
  }
  func.func @transform_4(%arg0: i32, %arg1: i32) -> (i32, i32, i32) {
    %c0_i32 = arith.constant 0 : i32
    %c0_i32_0 = arith.constant 0 : i32
    return %arg0, %arg1, %c0_i32 : i32, i32, i32
  }
  func.func @transform_5(%arg0: i32, %arg1: i32) -> (i32, i32, i32) {
    %c0_i32 = arith.constant 0 : i32
    %c0_i32_0 = arith.constant 0 : i32
    return %arg0, %arg1, %c0_i32 : i32, i32, i32
  }
}

module attributes {stable_mosaic.version = 11 : i64} {
  func.func @_linear_kernel(%arg0: i32, %arg1: memref<8x32xf32, #tpu.memory_space<vmem>>, %arg2: memref<32x32xbf16, #tpu.memory_space<vmem>>, %arg3: memref<1x32xf32, #tpu.memory_space<vmem>>, %arg4: memref<8x32xbf16, #tpu.memory_space<vmem>>) attributes {dimension_semantics = [#tpu.dimension_semantics<parallel>], iteration_bounds = array<i64: 2>, scalar_prefetch = 0 : i64, scratch_operands = 0 : i64, tpu.core_type = #tpu.core_type<tc>, window_params = [{transform_indices = @transform_0, window_bounds = array<i64: 8, 32>}, {pipeline_mode = #tpu.pipeline_mode<synchronous>, transform_indices = @transform_1, window_bounds = array<i64: 32, 32>}, {pipeline_mode = #tpu.pipeline_mode<synchronous>, transform_indices = @transform_2, window_bounds = array<i64: 1, 32>}, {transform_indices = @transform_3, window_bounds = array<i64: 8, 32>}]} {
    %c0 = arith.constant 0 : index
    %c0_0 = arith.constant 0 : index
    %0 = vector.load %arg1[%c0, %c0_0] : memref<8x32xf32, #tpu.memory_space<vmem>>, vector<8x32xf32>
    %1 = arith.truncf %0 : vector<8x32xf32> to vector<8x32xbf16>
    %c0_1 = arith.constant 0 : index
    %c0_2 = arith.constant 0 : index
    %2 = vector.load %arg2[%c0_1, %c0_2] : memref<32x32xbf16, #tpu.memory_space<vmem>>, vector<32x32xbf16>
    %cst = arith.constant dense<0.000000e+00> : vector<8x32xf32>
    %3 = tpu.matmul %1, %2, %cst {dimension_numbers = #tpu.dot_dimension_numbers<[1], [0], [0], [1], [0, 0, 1, 1], [], []>} : vector<8x32xbf16>, vector<32x32xbf16>, vector<8x32xf32> -> vector<8x32xf32>
    %c0_3 = arith.constant 0 : index
    %c0_4 = arith.constant 0 : index
    %4 = vector.load %arg3[%c0_3, %c0_4] : memref<1x32xf32, #tpu.memory_space<vmem>>, vector<1x32xf32>
    %5 = vector.broadcast %4 : vector<1x32xf32> to vector<8x32xf32>
    %6 = arith.addf %3, %5 : vector<8x32xf32>
    %7 = arith.truncf %6 : vector<8x32xf32> to vector<8x32xbf16>
    %c0_5 = arith.constant 0 : index
    %c0_6 = arith.constant 0 : index
    %8 = vector.load %arg4[%c0_5, %c0_6] : memref<8x32xbf16, #tpu.memory_space<vmem>>, vector<8x32xbf16>
    tpu.vector_store %arg4[%c0_5, %c0_6], %7 {strides = array<i32>} : memref<8x32xbf16, #tpu.memory_space<vmem>>, vector<8x32xbf16>,
    return
  }
  func.func @transform_0(%arg0: i32) -> (i32, i32) {
    %c0_i32 = arith.constant 0 : i32
    %c0_i32_0 = arith.constant 0 : i32
    return %arg0, %c0_i32 : i32, i32
  }
  func.func @transform_1(%arg0: i32) -> (i32, i32) {
    %c0_i32 = arith.constant 0 : i32
    %c0_i32_0 = arith.constant 0 : i32
    %c0_i32_1 = arith.constant 0 : i32
    return %c0_i32, %c0_i32_0 : i32, i32
  }
  func.func @transform_2(%arg0: i32) -> (i32, i32) {
    %c0_i32 = arith.constant 0 : i32
    %c0_i32_0 = arith.constant 0 : i32
    %c0_i32_1 = arith.constant 0 : i32
    return %c0_i32, %c0_i32_0 : i32, i32
  }
  func.func @transform_3(%arg0: i32) -> (i32, i32) {
    %c0_i32 = arith.constant 0 : i32
    %c0_i32_0 = arith.constant 0 : i32
    return %arg0, %c0_i32 : i32, i32
  }
}

module attributes {stable_mosaic.version = 11 : i64} {
  func.func @_proj_add_ln_kernel(%arg0: i32, %arg1: memref<8x32xbf16, #tpu.memory_space<vmem>>, %arg2: memref<32x32xbf16, #tpu.memory_space<vmem>>, %arg3: memref<1x32xf32, #tpu.memory_space<vmem>>, %arg4: memref<8x32xf32, #tpu.memory_space<vmem>>, %arg5: memref<1x32xf32, #tpu.memory_space<vmem>>, %arg6: memref<1x32xf32, #tpu.memory_space<vmem>>, %arg7: memref<8x32xf32, #tpu.memory_space<vmem>>) attributes {dimension_semantics = [#tpu.dimension_semantics<parallel>], iteration_bounds = array<i64: 2>, scalar_prefetch = 0 : i64, scratch_operands = 0 : i64, tpu.core_type = #tpu.core_type<tc>, window_params = [{transform_indices = @transform_0, window_bounds = array<i64: 8, 32>}, {pipeline_mode = #tpu.pipeline_mode<synchronous>, transform_indices = @transform_1, window_bounds = array<i64: 32, 32>}, {pipeline_mode = #tpu.pipeline_mode<synchronous>, transform_indices = @transform_2, window_bounds = array<i64: 1, 32>}, {transform_indices = @transform_3, window_bounds = array<i64: 8, 32>}, {pipeline_mode = #tpu.pipeline_mode<synchronous>, transform_indices = @transform_4, window_bounds = array<i64: 1, 32>}, {pipeline_mode = #tpu.pipeline_mode<synchronous>, transform_indices = @transform_5, window_bounds = array<i64: 1, 32>}, {transform_indices = @transform_6, window_bounds = array<i64: 8, 32>}]} {
    %c0 = arith.constant 0 : index
    %c0_0 = arith.constant 0 : index
    %0 = vector.load %arg1[%c0, %c0_0] : memref<8x32xbf16, #tpu.memory_space<vmem>>, vector<8x32xbf16>
    %c0_1 = arith.constant 0 : index
    %c0_2 = arith.constant 0 : index
    %1 = vector.load %arg2[%c0_1, %c0_2] : memref<32x32xbf16, #tpu.memory_space<vmem>>, vector<32x32xbf16>
    %cst = arith.constant dense<0.000000e+00> : vector<8x32xf32>
    %2 = tpu.matmul %0, %1, %cst {dimension_numbers = #tpu.dot_dimension_numbers<[1], [0], [0], [1], [0, 0, 1, 1], [], []>} : vector<8x32xbf16>, vector<32x32xbf16>, vector<8x32xf32> -> vector<8x32xf32>
    %c0_3 = arith.constant 0 : index
    %c0_4 = arith.constant 0 : index
    %3 = vector.load %arg3[%c0_3, %c0_4] : memref<1x32xf32, #tpu.memory_space<vmem>>, vector<1x32xf32>
    %4 = vector.broadcast %3 : vector<1x32xf32> to vector<8x32xf32>
    %5 = arith.addf %2, %4 : vector<8x32xf32>
    %c0_5 = arith.constant 0 : index
    %c0_6 = arith.constant 0 : index
    %6 = vector.load %arg4[%c0_5, %c0_6] : memref<8x32xf32, #tpu.memory_space<vmem>>, vector<8x32xf32>
    %7 = arith.addf %6, %5 : vector<8x32xf32>
    %c0_7 = arith.constant 0 : index
    %c0_8 = arith.constant 0 : index
    %8 = vector.load %arg5[%c0_7, %c0_8] : memref<1x32xf32, #tpu.memory_space<vmem>>, vector<1x32xf32>
    %c0_9 = arith.constant 0 : index
    %c0_10 = arith.constant 0 : index
    %9 = vector.load %arg6[%c0_9, %c0_10] : memref<1x32xf32, #tpu.memory_space<vmem>>, vector<1x32xf32>
    %cst_11 = arith.constant dense<0.000000e+00> : vector<8xf32>
    %10 = vector.multi_reduction <add>, %7, %cst_11 [1] : vector<8x32xf32> to vector<8xf32>
    %11 = vector.shape_cast %10 : vector<8xf32> to vector<8x1xf32>
    %cst_12 = arith.constant 3.200000e+01 : f32
    %12 = vector.broadcast %cst_12 : f32 to vector<8x1xf32>
    %13 = arith.divf %11, %12 : vector<8x1xf32>
    %14 = vector.broadcast %13 : vector<8x1xf32> to vector<8x32xf32>
    %15 = arith.subf %7, %14 : vector<8x32xf32>
    %16 = arith.mulf %15, %15 : vector<8x32xf32>
    %cst_13 = arith.constant dense<0.000000e+00> : vector<8xf32>
    %17 = vector.multi_reduction <add>, %16, %cst_13 [1] : vector<8x32xf32> to vector<8xf32>
    %18 = vector.shape_cast %17 : vector<8xf32> to vector<8x1xf32>
    %cst_14 = arith.constant 3.200000e+01 : f32
    %19 = vector.broadcast %cst_14 : f32 to vector<8x1xf32>
    %20 = arith.divf %18, %19 : vector<8x1xf32>
    %21 = vector.broadcast %13 : vector<8x1xf32> to vector<8x32xf32>
    %22 = arith.subf %7, %21 : vector<8x32xf32>
    %cst_15 = arith.constant 9.99999974E-6 : f32
    %23 = vector.broadcast %cst_15 : f32 to vector<8x1xf32>
    %24 = arith.addf %20, %23 : vector<8x1xf32>
    %25 = math.rsqrt %24 : vector<8x1xf32>
    %26 = vector.broadcast %25 : vector<8x1xf32> to vector<8x32xf32>
    %27 = arith.mulf %22, %26 : vector<8x32xf32>
    %28 = vector.broadcast %8 : vector<1x32xf32> to vector<8x32xf32>
    %29 = arith.mulf %27, %28 : vector<8x32xf32>
    %30 = vector.broadcast %9 : vector<1x32xf32> to vector<8x32xf32>
    %31 = arith.addf %29, %30 : vector<8x32xf32>
    %c0_16 = arith.constant 0 : index
    %c0_17 = arith.constant 0 : index
    %32 = vector.load %arg7[%c0_16, %c0_17] : memref<8x32xf32, #tpu.memory_space<vmem>>, vector<8x32xf32>
    tpu.vector_store %arg7[%c0_16, %c0_17], %31 {strides = array<i32>} : memref<8x32xf32, #tpu.memory_space<vmem>>, vector<8x32xf32>,
    return
  }
  func.func @transform_0(%arg0: i32) -> (i32, i32) {
    %c0_i32 = arith.constant 0 : i32
    %c0_i32_0 = arith.constant 0 : i32
    return %arg0, %c0_i32 : i32, i32
  }
  func.func @transform_1(%arg0: i32) -> (i32, i32) {
    %c0_i32 = arith.constant 0 : i32
    %c0_i32_0 = arith.constant 0 : i32
    %c0_i32_1 = arith.constant 0 : i32
    return %c0_i32, %c0_i32_0 : i32, i32
  }
  func.func @transform_2(%arg0: i32) -> (i32, i32) {
    %c0_i32 = arith.constant 0 : i32
    %c0_i32_0 = arith.constant 0 : i32
    %c0_i32_1 = arith.constant 0 : i32
    return %c0_i32, %c0_i32_0 : i32, i32
  }
  func.func @transform_3(%arg0: i32) -> (i32, i32) {
    %c0_i32 = arith.constant 0 : i32
    %c0_i32_0 = arith.constant 0 : i32
    return %arg0, %c0_i32 : i32, i32
  }
  func.func @transform_4(%arg0: i32) -> (i32, i32) {
    %c0_i32 = arith.constant 0 : i32
    %c0_i32_0 = arith.constant 0 : i32
    %c0_i32_1 = arith.constant 0 : i32
    return %c0_i32, %c0_i32_0 : i32, i32
  }
  func.func @transform_5(%arg0: i32) -> (i32, i32) {
    %c0_i32 = arith.constant 0 : i32
    %c0_i32_0 = arith.constant 0 : i32
    %c0_i32_1 = arith.constant 0 : i32
    return %c0_i32, %c0_i32_0 : i32, i32
  }
  func.func @transform_6(%arg0: i32) -> (i32, i32) {
    %c0_i32 = arith.constant 0 : i32
    %c0_i32_0 = arith.constant 0 : i32
    return %arg0, %c0_i32 : i32, i32
  }
}

module attributes {stable_mosaic.version = 11 : i64} {
  func.func @_kv_kernel(%arg0: i32, %arg1: memref<8x32xf32, #tpu.memory_space<vmem>>, %arg2: memref<32x32xbf16, #tpu.memory_space<vmem>>, %arg3: memref<1x32xf32, #tpu.memory_space<vmem>>, %arg4: memref<32x32xbf16, #tpu.memory_space<vmem>>, %arg5: memref<1x32xf32, #tpu.memory_space<vmem>>, %arg6: memref<8x32xbf16, #tpu.memory_space<vmem>>, %arg7: memref<8x32xbf16, #tpu.memory_space<vmem>>) attributes {dimension_semantics = [#tpu.dimension_semantics<parallel>], iteration_bounds = array<i64: 2>, scalar_prefetch = 0 : i64, scratch_operands = 0 : i64, tpu.core_type = #tpu.core_type<tc>, window_params = [{transform_indices = @transform_0, window_bounds = array<i64: 8, 32>}, {pipeline_mode = #tpu.pipeline_mode<synchronous>, transform_indices = @transform_1, window_bounds = array<i64: 32, 32>}, {pipeline_mode = #tpu.pipeline_mode<synchronous>, transform_indices = @transform_2, window_bounds = array<i64: 1, 32>}, {pipeline_mode = #tpu.pipeline_mode<synchronous>, transform_indices = @transform_3, window_bounds = array<i64: 32, 32>}, {pipeline_mode = #tpu.pipeline_mode<synchronous>, transform_indices = @transform_4, window_bounds = array<i64: 1, 32>}, {transform_indices = @transform_5, window_bounds = array<i64: 8, 32>}, {transform_indices = @transform_6, window_bounds = array<i64: 8, 32>}]} {
    %c0 = arith.constant 0 : index
    %c0_0 = arith.constant 0 : index
    %0 = vector.load %arg1[%c0, %c0_0] : memref<8x32xf32, #tpu.memory_space<vmem>>, vector<8x32xf32>
    %1 = arith.truncf %0 : vector<8x32xf32> to vector<8x32xbf16>
    %c0_1 = arith.constant 0 : index
    %c0_2 = arith.constant 0 : index
    %2 = vector.load %arg2[%c0_1, %c0_2] : memref<32x32xbf16, #tpu.memory_space<vmem>>, vector<32x32xbf16>
    %cst = arith.constant dense<0.000000e+00> : vector<8x32xf32>
    %3 = tpu.matmul %1, %2, %cst {dimension_numbers = #tpu.dot_dimension_numbers<[1], [0], [0], [1], [0, 0, 1, 1], [], []>} : vector<8x32xbf16>, vector<32x32xbf16>, vector<8x32xf32> -> vector<8x32xf32>
    %c0_3 = arith.constant 0 : index
    %c0_4 = arith.constant 0 : index
    %4 = vector.load %arg3[%c0_3, %c0_4] : memref<1x32xf32, #tpu.memory_space<vmem>>, vector<1x32xf32>
    %5 = vector.broadcast %4 : vector<1x32xf32> to vector<8x32xf32>
    %6 = arith.addf %3, %5 : vector<8x32xf32>
    %7 = arith.truncf %6 : vector<8x32xf32> to vector<8x32xbf16>
    %c0_5 = arith.constant 0 : index
    %c0_6 = arith.constant 0 : index
    %8 = vector.load %arg6[%c0_5, %c0_6] : memref<8x32xbf16, #tpu.memory_space<vmem>>, vector<8x32xbf16>
    tpu.vector_store %arg6[%c0_5, %c0_6], %7 {strides = array<i32>} : memref<8x32xbf16, #tpu.memory_space<vmem>>, vector<8x32xbf16>,
    %c0_7 = arith.constant 0 : index
    %c0_8 = arith.constant 0 : index
    %9 = vector.load %arg4[%c0_7, %c0_8] : memref<32x32xbf16, #tpu.memory_space<vmem>>, vector<32x32xbf16>
    %cst_9 = arith.constant dense<0.000000e+00> : vector<8x32xf32>
    %10 = tpu.matmul %1, %9, %cst_9 {dimension_numbers = #tpu.dot_dimension_numbers<[1], [0], [0], [1], [0, 0, 1, 1], [], []>} : vector<8x32xbf16>, vector<32x32xbf16>, vector<8x32xf32> -> vector<8x32xf32>
    %c0_10 = arith.constant 0 : index
    %c0_11 = arith.constant 0 : index
    %11 = vector.load %arg5[%c0_10, %c0_11] : memref<1x32xf32, #tpu.memory_space<vmem>>, vector<1x32xf32>
    %12 = vector.broadcast %11 : vector<1x32xf32> to vector<8x32xf32>
    %13 = arith.addf %10, %12 : vector<8x32xf32>
    %14 = arith.truncf %13 : vector<8x32xf32> to vector<8x32xbf16>
    %c0_12 = arith.constant 0 : index
    %c0_13 = arith.constant 0 : index
    %15 = vector.load %arg7[%c0_12, %c0_13] : memref<8x32xbf16, #tpu.memory_space<vmem>>, vector<8x32xbf16>
    tpu.vector_store %arg7[%c0_12, %c0_13], %14 {strides = array<i32>} : memref<8x32xbf16, #tpu.memory_space<vmem>>, vector<8x32xbf16>,
    return
  }
  func.func @transform_0(%arg0: i32) -> (i32, i32) {
    %c0_i32 = arith.constant 0 : i32
    %c0_i32_0 = arith.constant 0 : i32
    return %arg0, %c0_i32 : i32, i32
  }
  func.func @transform_1(%arg0: i32) -> (i32, i32) {
    %c0_i32 = arith.constant 0 : i32
    %c0_i32_0 = arith.constant 0 : i32
    %c0_i32_1 = arith.constant 0 : i32
    return %c0_i32, %c0_i32_0 : i32, i32
  }
  func.func @transform_2(%arg0: i32) -> (i32, i32) {
    %c0_i32 = arith.constant 0 : i32
    %c0_i32_0 = arith.constant 0 : i32
    %c0_i32_1 = arith.constant 0 : i32
    return %c0_i32, %c0_i32_0 : i32, i32
  }
  func.func @transform_3(%arg0: i32) -> (i32, i32) {
    %c0_i32 = arith.constant 0 : i32
    %c0_i32_0 = arith.constant 0 : i32
    %c0_i32_1 = arith.constant 0 : i32
    return %c0_i32, %c0_i32_0 : i32, i32
  }
  func.func @transform_4(%arg0: i32) -> (i32, i32) {
    %c0_i32 = arith.constant 0 : i32
    %c0_i32_0 = arith.constant 0 : i32
    %c0_i32_1 = arith.constant 0 : i32
    return %c0_i32, %c0_i32_0 : i32, i32
  }
  func.func @transform_5(%arg0: i32) -> (i32, i32) {
    %c0_i32 = arith.constant 0 : i32
    %c0_i32_0 = arith.constant 0 : i32
    return %arg0, %c0_i32 : i32, i32
  }
  func.func @transform_6(%arg0: i32) -> (i32, i32) {
    %c0_i32 = arith.constant 0 : i32
    %c0_i32_0 = arith.constant 0 : i32
    return %arg0, %c0_i32 : i32, i32
  }
}

module attributes {stable_mosaic.version = 11 : i64} {
  func.func @_attn_kernel_nomask(%arg0: i32, %arg1: i32, %arg2: memref<2x8x8xbf16, #tpu.memory_space<vmem>>, %arg3: memref<2x8x8xbf16, #tpu.memory_space<vmem>>, %arg4: memref<2x8x8xbf16, #tpu.memory_space<vmem>>, %arg5: memref<2x8x8xbf16, #tpu.memory_space<vmem>>, %arg6: memref<2x8x8xf32, #tpu.memory_space<vmem>>) attributes {dimension_semantics = [#tpu.dimension_semantics<parallel>, #tpu.dimension_semantics<parallel>], iteration_bounds = array<i64: 4, 1>, scalar_prefetch = 0 : i64, scratch_operands = 0 : i64, tpu.core_type = #tpu.core_type<tc>, window_params = [{transform_indices = @transform_0, window_bounds = array<i64: 2, 8, 8>}, {transform_indices = @transform_1, window_bounds = array<i64: 2, 8, 8>}, {transform_indices = @transform_2, window_bounds = array<i64: 2, 8, 8>}, {transform_indices = @transform_3, window_bounds = array<i64: 2, 8, 8>}, {transform_indices = @transform_4, window_bounds = array<i64: 2, 8, 8>}]} {
    %c0 = arith.constant 0 : index
    %c0_0 = arith.constant 0 : index
    %c0_1 = arith.constant 0 : index
    %0 = vector.load %arg2[%c0, %c0_0, %c0_1] : memref<2x8x8xbf16, #tpu.memory_space<vmem>>, vector<2x8x8xbf16>
    %c0_2 = arith.constant 0 : index
    %c0_3 = arith.constant 0 : index
    %c0_4 = arith.constant 0 : index
    %1 = vector.load %arg3[%c0_2, %c0_3, %c0_4] : memref<2x8x8xbf16, #tpu.memory_space<vmem>>, vector<2x8x8xbf16>
    %c0_5 = arith.constant 0 : index
    %c0_6 = arith.constant 0 : index
    %c0_7 = arith.constant 0 : index
    %2 = vector.load %arg4[%c0_5, %c0_6, %c0_7] : memref<2x8x8xbf16, #tpu.memory_space<vmem>>, vector<2x8x8xbf16>
    "tpu.trace_start"() <{level = 10 : i32, message = "bqd,bkd->bqk"}> : () -> ()
    %cst = arith.constant dense<0.000000e+00> : vector<2x8x8xf32>
    %3 = tpu.matmul %0, %1, %cst {dimension_numbers = #tpu.dot_dimension_numbers<[2], [2], [1], [1], [0, 0, 0, 1, 1, 1], [0], [0]>} : vector<2x8x8xbf16>, vector<2x8x8xbf16>, vector<2x8x8xf32> -> vector<2x8x8xf32>
    "tpu.trace_stop"() : () -> ()
    %cst_8 = arith.constant 0.353553385 : f32
    %4 = vector.broadcast %cst_8 : f32 to vector<2x8x8xf32>
    %5 = arith.mulf %3, %4 : vector<2x8x8xf32>
    %cst_9 = arith.constant dense<0xFF800000> : vector<2x8xf32>
    %6 = vector.multi_reduction <maximumf>, %5, %cst_9 [2] : vector<2x8x8xf32> to vector<2x8xf32>
    %7 = vector.shape_cast %6 : vector<2x8xf32> to vector<2x8x1xf32>
    %8 = vector.broadcast %7 : vector<2x8x1xf32> to vector<2x8x8xf32>
    %9 = arith.subf %5, %8 : vector<2x8x8xf32>
    %10 = math.exp %9 : vector<2x8x8xf32>
    %cst_10 = arith.constant dense<0.000000e+00> : vector<2x8xf32>
    %11 = vector.multi_reduction <add>, %10, %cst_10 [2] : vector<2x8x8xf32> to vector<2x8xf32>
    %12 = vector.shape_cast %11 : vector<2x8xf32> to vector<2x8x1xf32>
    %13 = tpu.reciprocal %12 {approx = true} : vector<2x8x1xf32> -> vector<2x8x1xf32>
    %14 = vector.broadcast %13 : vector<2x8x1xf32> to vector<2x8x8xf32>
    %15 = arith.mulf %10, %14 : vector<2x8x8xf32>
    %c0_11 = arith.constant 0 : index
    %c0_12 = arith.constant 0 : index
    %c0_13 = arith.constant 0 : index
    %16 = vector.load %arg6[%c0_11, %c0_12, %c0_13] : memref<2x8x8xf32, #tpu.memory_space<vmem>>, vector<2x8x8xf32>
    tpu.vector_store %arg6[%c0_11, %c0_12, %c0_13], %15 {strides = array<i32>} : memref<2x8x8xf32, #tpu.memory_space<vmem>>, vector<2x8x8xf32>,
    %17 = arith.truncf %15 : vector<2x8x8xf32> to vector<2x8x8xbf16>
    "tpu.trace_start"() <{level = 10 : i32, message = "bqk,bkd->bqd"}> : () -> ()
    %cst_14 = arith.constant dense<0.000000e+00> : vector<2x8x8xf32>
    %18 = tpu.matmul %17, %2, %cst_14 {dimension_numbers = #tpu.dot_dimension_numbers<[2], [1], [1], [2], [0, 0, 0, 1, 1, 2], [0], [0]>} : vector<2x8x8xbf16>, vector<2x8x8xbf16>, vector<2x8x8xf32> -> vector<2x8x8xf32>
    "tpu.trace_stop"() : () -> ()
    %19 = arith.truncf %18 : vector<2x8x8xf32> to vector<2x8x8xbf16>
    %c0_15 = arith.constant 0 : index
    %c0_16 = arith.constant 0 : index
    %c0_17 = arith.constant 0 : index
    %20 = vector.load %arg5[%c0_15, %c0_16, %c0_17] : memref<2x8x8xbf16, #tpu.memory_space<vmem>>, vector<2x8x8xbf16>
    tpu.vector_store %arg5[%c0_15, %c0_16, %c0_17], %19 {strides = array<i32>} : memref<2x8x8xbf16, #tpu.memory_space<vmem>>, vector<2x8x8xbf16>,
    return
  }
  func.func @transform_0(%arg0: i32, %arg1: i32) -> (i32, i32, i32) {
    %c0_i32 = arith.constant 0 : i32
    %c0_i32_0 = arith.constant 0 : i32
    return %arg0, %arg1, %c0_i32 : i32, i32, i32
  }
  func.func @transform_1(%arg0: i32, %arg1: i32) -> (i32, i32, i32) {
    %c0_i32 = arith.constant 0 : i32
    %c0_i32_0 = arith.constant 0 : i32
    %c0_i32_1 = arith.constant 0 : i32
    return %arg0, %c0_i32, %c0_i32_0 : i32, i32, i32
  }
  func.func @transform_2(%arg0: i32, %arg1: i32) -> (i32, i32, i32) {
    %c0_i32 = arith.constant 0 : i32
    %c0_i32_0 = arith.constant 0 : i32
    %c0_i32_1 = arith.constant 0 : i32
    return %arg0, %c0_i32, %c0_i32_0 : i32, i32, i32
  }
  func.func @transform_3(%arg0: i32, %arg1: i32) -> (i32, i32, i32) {
    %c0_i32 = arith.constant 0 : i32
    %c0_i32_0 = arith.constant 0 : i32
    return %arg0, %arg1, %c0_i32 : i32, i32, i32
  }
  func.func @transform_4(%arg0: i32, %arg1: i32) -> (i32, i32, i32) {
    %c0_i32 = arith.constant 0 : i32
    %c0_i32_0 = arith.constant 0 : i32
    return %arg0, %arg1, %c0_i32 : i32, i32, i32
  }
}

module attributes {stable_mosaic.version = 11 : i64} {
  func.func @_ffn_add_ln_kernel(%arg0: i32, %arg1: i32, %arg2: memref<8x32xf32, #tpu.memory_space<vmem>>, %arg3: memref<32x64xbf16, #tpu.memory_space<vmem>>, %arg4: memref<1x64xf32, #tpu.memory_space<vmem>>, %arg5: memref<64x32xbf16, #tpu.memory_space<vmem>>, %arg6: memref<1x32xf32, #tpu.memory_space<vmem>>, %arg7: memref<1x32xf32, #tpu.memory_space<vmem>>, %arg8: memref<1x32xf32, #tpu.memory_space<vmem>>, %arg9: memref<8x32xf32, #tpu.memory_space<vmem>>, %arg10: memref<8x32xf32, #tpu.memory_space<vmem>>) attributes {dimension_semantics = [#tpu.dimension_semantics<parallel>, #tpu.dimension_semantics<arbitrary>], iteration_bounds = array<i64: 2, 1>, scalar_prefetch = 0 : i64, scratch_operands = 1 : i64, tpu.core_type = #tpu.core_type<tc>, window_params = [{transform_indices = @transform_0, window_bounds = array<i64: 8, 32>}, {transform_indices = @transform_1, window_bounds = array<i64: 32, 64>}, {transform_indices = @transform_2, window_bounds = array<i64: 1, 64>}, {transform_indices = @transform_3, window_bounds = array<i64: 64, 32>}, {pipeline_mode = #tpu.pipeline_mode<synchronous>, transform_indices = @transform_4, window_bounds = array<i64: 1, 32>}, {pipeline_mode = #tpu.pipeline_mode<synchronous>, transform_indices = @transform_5, window_bounds = array<i64: 1, 32>}, {pipeline_mode = #tpu.pipeline_mode<synchronous>, transform_indices = @transform_6, window_bounds = array<i64: 1, 32>}, {transform_indices = @transform_7, window_bounds = array<i64: 8, 32>}]} {
    %c0_i32 = arith.constant 0 : i32
    %0 = arith.cmpi eq, %arg1, %c0_i32 : i32
    %1 = arith.extui %0 : i1 to i32
    %c0_i32_0 = arith.constant 0 : i32
    %2 = arith.cmpi ne, %1, %c0_i32_0 : i32
    scf.if %2 {
      %cst_16 = arith.constant 0.000000e+00 : f32
      %21 = vector.broadcast %cst_16 : f32 to vector<8x32xf32>
      %c0_17 = arith.constant 0 : index
      %c0_18 = arith.constant 0 : index
      %22 = vector.load %arg10[%c0_17, %c0_18] : memref<8x32xf32, #tpu.memory_space<vmem>>, vector<8x32xf32>
      tpu.vector_store %arg10[%c0_17, %c0_18], %21 {strides = array<i32>} : memref<8x32xf32, #tpu.memory_space<vmem>>, vector<8x32xf32>,
    } else {
    }
    %c0 = arith.constant 0 : index
    %c0_1 = arith.constant 0 : index
    %3 = vector.load %arg2[%c0, %c0_1] : memref<8x32xf32, #tpu.memory_space<vmem>>, vector<8x32xf32>
    %4 = arith.truncf %3 : vector<8x32xf32> to vector<8x32xbf16>
    %c0_2 = arith.constant 0 : index
    %c0_3 = arith.constant 0 : index
    %5 = vector.load %arg3[%c0_2, %c0_3] : memref<32x64xbf16, #tpu.memory_space<vmem>>, vector<32x64xbf16>
    %cst = arith.constant dense<0.000000e+00> : vector<8x64xf32>
    %6 = tpu.matmul %4, %5, %cst {dimension_numbers = #tpu.dot_dimension_numbers<[1], [0], [0], [1], [0, 0, 1, 1], [], []>} : vector<8x32xbf16>, vector<32x64xbf16>, vector<8x64xf32> -> vector<8x64xf32>
    %c0_4 = arith.constant 0 : index
    %c0_5 = arith.constant 0 : index
    %7 = vector.load %arg4[%c0_4, %c0_5] : memref<1x64xf32, #tpu.memory_space<vmem>>, vector<1x64xf32>
    %8 = vector.broadcast %7 : vector<1x64xf32> to vector<8x64xf32>
    %9 = arith.addf %6, %8 : vector<8x64xf32>
    %cst_6 = arith.constant 0.000000e+00 : f32
    %10 = vector.broadcast %cst_6 : f32 to vector<8x64xf32>
    %11 = arith.maximumf %9, %10 : vector<8x64xf32>
    %c0_7 = arith.constant 0 : index
    %c0_8 = arith.constant 0 : index
    %12 = vector.load %arg10[%c0_7, %c0_8] : memref<8x32xf32, #tpu.memory_space<vmem>>, vector<8x32xf32>
    %13 = arith.truncf %11 : vector<8x64xf32> to vector<8x64xbf16>
    %c0_9 = arith.constant 0 : index
    %c0_10 = arith.constant 0 : index
    %14 = vector.load %arg5[%c0_9, %c0_10] : memref<64x32xbf16, #tpu.memory_space<vmem>>, vector<64x32xbf16>
    %cst_11 = arith.constant dense<0.000000e+00> : vector<8x32xf32>
    %15 = tpu.matmul %13, %14, %cst_11 {dimension_numbers = #tpu.dot_dimension_numbers<[1], [0], [0], [1], [0, 0, 1, 1], [], []>} : vector<8x64xbf16>, vector<64x32xbf16>, vector<8x32xf32> -> vector<8x32xf32>
    %16 = arith.addf %12, %15 : vector<8x32xf32>
    %c0_12 = arith.constant 0 : index
    %c0_13 = arith.constant 0 : index
    %17 = vector.load %arg10[%c0_12, %c0_13] : memref<8x32xf32, #tpu.memory_space<vmem>>, vector<8x32xf32>
    tpu.vector_store %arg10[%c0_12, %c0_13], %16 {strides = array<i32>} : memref<8x32xf32, #tpu.memory_space<vmem>>, vector<8x32xf32>,
    %c0_i32_14 = arith.constant 0 : i32
    %18 = arith.cmpi eq, %arg1, %c0_i32_14 : i32
    %19 = arith.extui %18 : i1 to i32
    %c0_i32_15 = arith.constant 0 : i32
    %20 = arith.cmpi ne, %19, %c0_i32_15 : i32
    scf.if %20 {
      %c0_16 = arith.constant 0 : index
      %c0_17 = arith.constant 0 : index
      %21 = vector.load %arg10[%c0_16, %c0_17] : memref<8x32xf32, #tpu.memory_space<vmem>>, vector<8x32xf32>
      %22 = arith.addf %3, %21 : vector<8x32xf32>
      %c0_18 = arith.constant 0 : index
      %c0_19 = arith.constant 0 : index
      %23 = vector.load %arg6[%c0_18, %c0_19] : memref<1x32xf32, #tpu.memory_space<vmem>>, vector<1x32xf32>
      %24 = vector.broadcast %23 : vector<1x32xf32> to vector<8x32xf32>
      %25 = arith.addf %22, %24 : vector<8x32xf32>
      %c0_20 = arith.constant 0 : index
      %c0_21 = arith.constant 0 : index
      %26 = vector.load %arg7[%c0_20, %c0_21] : memref<1x32xf32, #tpu.memory_space<vmem>>, vector<1x32xf32>
      %c0_22 = arith.constant 0 : index
      %c0_23 = arith.constant 0 : index
      %27 = vector.load %arg8[%c0_22, %c0_23] : memref<1x32xf32, #tpu.memory_space<vmem>>, vector<1x32xf32>
      %cst_24 = arith.constant dense<0.000000e+00> : vector<8xf32>
      %28 = vector.multi_reduction <add>, %25, %cst_24 [1] : vector<8x32xf32> to vector<8xf32>
      %29 = vector.shape_cast %28 : vector<8xf32> to vector<8x1xf32>
      %cst_25 = arith.constant 3.200000e+01 : f32
      %30 = vector.broadcast %cst_25 : f32 to vector<8x1xf32>
      %31 = arith.divf %29, %30 : vector<8x1xf32>
      %32 = vector.broadcast %31 : vector<8x1xf32> to vector<8x32xf32>
      %33 = arith.subf %25, %32 : vector<8x32xf32>
      %34 = arith.mulf %33, %33 : vector<8x32xf32>
      %cst_26 = arith.constant dense<0.000000e+00> : vector<8xf32>
      %35 = vector.multi_reduction <add>, %34, %cst_26 [1] : vector<8x32xf32> to vector<8xf32>
      %36 = vector.shape_cast %35 : vector<8xf32> to vector<8x1xf32>
      %cst_27 = arith.constant 3.200000e+01 : f32
      %37 = vector.broadcast %cst_27 : f32 to vector<8x1xf32>
      %38 = arith.divf %36, %37 : vector<8x1xf32>
      %39 = vector.broadcast %31 : vector<8x1xf32> to vector<8x32xf32>
      %40 = arith.subf %25, %39 : vector<8x32xf32>
      %cst_28 = arith.constant 9.99999974E-6 : f32
      %41 = vector.broadcast %cst_28 : f32 to vector<8x1xf32>
      %42 = arith.addf %38, %41 : vector<8x1xf32>
      %43 = math.rsqrt %42 : vector<8x1xf32>
      %44 = vector.broadcast %43 : vector<8x1xf32> to vector<8x32xf32>
      %45 = arith.mulf %40, %44 : vector<8x32xf32>
      %46 = vector.broadcast %26 : vector<1x32xf32> to vector<8x32xf32>
      %47 = arith.mulf %45, %46 : vector<8x32xf32>
      %48 = vector.broadcast %27 : vector<1x32xf32> to vector<8x32xf32>
      %49 = arith.addf %47, %48 : vector<8x32xf32>
      %c0_29 = arith.constant 0 : index
      %c0_30 = arith.constant 0 : index
      %50 = vector.load %arg9[%c0_29, %c0_30] : memref<8x32xf32, #tpu.memory_space<vmem>>, vector<8x32xf32>
      tpu.vector_store %arg9[%c0_29, %c0_30], %49 {strides = array<i32>} : memref<8x32xf32, #tpu.memory_space<vmem>>, vector<8x32xf32>,
    } else {
    }
    return
  }
  func.func @transform_0(%arg0: i32, %arg1: i32) -> (i32, i32) {
    %c0_i32 = arith.constant 0 : i32
    %c0_i32_0 = arith.constant 0 : i32
    return %arg0, %c0_i32 : i32, i32
  }
  func.func @transform_1(%arg0: i32, %arg1: i32) -> (i32, i32) {
    %c0_i32 = arith.constant 0 : i32
    %c0_i32_0 = arith.constant 0 : i32
    return %c0_i32, %arg1 : i32, i32
  }
  func.func @transform_2(%arg0: i32, %arg1: i32) -> (i32, i32) {
    %c0_i32 = arith.constant 0 : i32
    %c0_i32_0 = arith.constant 0 : i32
    return %c0_i32, %arg1 : i32, i32
  }
  func.func @transform_3(%arg0: i32, %arg1: i32) -> (i32, i32) {
    %c0_i32 = arith.constant 0 : i32
    %c0_i32_0 = arith.constant 0 : i32
    return %arg1, %c0_i32 : i32, i32
  }
  func.func @transform_4(%arg0: i32, %arg1: i32) -> (i32, i32) {
    %c0_i32 = arith.constant 0 : i32
    %c0_i32_0 = arith.constant 0 : i32
    %c0_i32_1 = arith.constant 0 : i32
    return %c0_i32, %c0_i32_0 : i32, i32
  }
  func.func @transform_5(%arg0: i32, %arg1: i32) -> (i32, i32) {
    %c0_i32 = arith.constant 0 : i32
    %c0_i32_0 = arith.constant 0 : i32
    %c0_i32_1 = arith.constant 0 : i32
    return %c0_i32, %c0_i32_0 : i32, i32
  }
  func.func @transform_6(%arg0: i32, %arg1: i32) -> (i32, i32) {
    %c0_i32 = arith.constant 0 : i32
    %c0_i32_0 = arith.constant 0 : i32
    %c0_i32_1 = arith.constant 0 : i32
    return %c0_i32, %c0_i32_0 : i32, i32
  }
  func.func @transform_7(%arg0: i32, %arg1: i32) -> (i32, i32) {
    %c0_i32 = arith.constant 0 : i32
    %c0_i32_0 = arith.constant 0 : i32
    return %arg0, %c0_i32 : i32, i32
  }
}

module attributes {stable_mosaic.version = 11 : i64} {
  func.func @_ffn_add_ln_kernel(%arg0: i32, %arg1: i32, %arg2: memref<8x32xf32, #tpu.memory_space<vmem>>, %arg3: memref<32x64xbf16, #tpu.memory_space<vmem>>, %arg4: memref<1x64xf32, #tpu.memory_space<vmem>>, %arg5: memref<64x32xbf16, #tpu.memory_space<vmem>>, %arg6: memref<1x32xf32, #tpu.memory_space<vmem>>, %arg7: memref<1x32xf32, #tpu.memory_space<vmem>>, %arg8: memref<1x32xf32, #tpu.memory_space<vmem>>, %arg9: memref<8x32xf32, #tpu.memory_space<vmem>>, %arg10: memref<8x32xf32, #tpu.memory_space<vmem>>) attributes {dimension_semantics = [#tpu.dimension_semantics<parallel>, #tpu.dimension_semantics<arbitrary>], iteration_bounds = array<i64: 2, 1>, scalar_prefetch = 0 : i64, scratch_operands = 1 : i64, tpu.core_type = #tpu.core_type<tc>, window_params = [{transform_indices = @transform_0, window_bounds = array<i64: 8, 32>}, {transform_indices = @transform_1, window_bounds = array<i64: 32, 64>}, {transform_indices = @transform_2, window_bounds = array<i64: 1, 64>}, {transform_indices = @transform_3, window_bounds = array<i64: 64, 32>}, {pipeline_mode = #tpu.pipeline_mode<synchronous>, transform_indices = @transform_4, window_bounds = array<i64: 1, 32>}, {pipeline_mode = #tpu.pipeline_mode<synchronous>, transform_indices = @transform_5, window_bounds = array<i64: 1, 32>}, {pipeline_mode = #tpu.pipeline_mode<synchronous>, transform_indices = @transform_6, window_bounds = array<i64: 1, 32>}, {transform_indices = @transform_7, window_bounds = array<i64: 8, 32>}]} {
    %c0_i32 = arith.constant 0 : i32
    %0 = arith.cmpi eq, %arg1, %c0_i32 : i32
    %1 = arith.extui %0 : i1 to i32
    %c0_i32_0 = arith.constant 0 : i32
    %2 = arith.cmpi ne, %1, %c0_i32_0 : i32
    scf.if %2 {
      %cst_16 = arith.constant 0.000000e+00 : f32
      %21 = vector.broadcast %cst_16 : f32 to vector<8x32xf32>
      %c0_17 = arith.constant 0 : index
      %c0_18 = arith.constant 0 : index
      %22 = vector.load %arg10[%c0_17, %c0_18] : memref<8x32xf32, #tpu.memory_space<vmem>>, vector<8x32xf32>
      tpu.vector_store %arg10[%c0_17, %c0_18], %21 {strides = array<i32>} : memref<8x32xf32, #tpu.memory_space<vmem>>, vector<8x32xf32>,
    } else {
    }
    %c0 = arith.constant 0 : index
    %c0_1 = arith.constant 0 : index
    %3 = vector.load %arg2[%c0, %c0_1] : memref<8x32xf32, #tpu.memory_space<vmem>>, vector<8x32xf32>
    %4 = arith.truncf %3 : vector<8x32xf32> to vector<8x32xbf16>
    %c0_2 = arith.constant 0 : index
    %c0_3 = arith.constant 0 : index
    %5 = vector.load %arg3[%c0_2, %c0_3] : memref<32x64xbf16, #tpu.memory_space<vmem>>, vector<32x64xbf16>
    %cst = arith.constant dense<0.000000e+00> : vector<8x64xf32>
    %6 = tpu.matmul %4, %5, %cst {dimension_numbers = #tpu.dot_dimension_numbers<[1], [0], [0], [1], [0, 0, 1, 1], [], []>} : vector<8x32xbf16>, vector<32x64xbf16>, vector<8x64xf32> -> vector<8x64xf32>
    %c0_4 = arith.constant 0 : index
    %c0_5 = arith.constant 0 : index
    %7 = vector.load %arg4[%c0_4, %c0_5] : memref<1x64xf32, #tpu.memory_space<vmem>>, vector<1x64xf32>
    %8 = vector.broadcast %7 : vector<1x64xf32> to vector<8x64xf32>
    %9 = arith.addf %6, %8 : vector<8x64xf32>
    %cst_6 = arith.constant 0.000000e+00 : f32
    %10 = vector.broadcast %cst_6 : f32 to vector<8x64xf32>
    %11 = arith.maximumf %9, %10 : vector<8x64xf32>
    %c0_7 = arith.constant 0 : index
    %c0_8 = arith.constant 0 : index
    %12 = vector.load %arg10[%c0_7, %c0_8] : memref<8x32xf32, #tpu.memory_space<vmem>>, vector<8x32xf32>
    %13 = arith.truncf %11 : vector<8x64xf32> to vector<8x64xbf16>
    %c0_9 = arith.constant 0 : index
    %c0_10 = arith.constant 0 : index
    %14 = vector.load %arg5[%c0_9, %c0_10] : memref<64x32xbf16, #tpu.memory_space<vmem>>, vector<64x32xbf16>
    %cst_11 = arith.constant dense<0.000000e+00> : vector<8x32xf32>
    %15 = tpu.matmul %13, %14, %cst_11 {dimension_numbers = #tpu.dot_dimension_numbers<[1], [0], [0], [1], [0, 0, 1, 1], [], []>} : vector<8x64xbf16>, vector<64x32xbf16>, vector<8x32xf32> -> vector<8x32xf32>
    %16 = arith.addf %12, %15 : vector<8x32xf32>
    %c0_12 = arith.constant 0 : index
    %c0_13 = arith.constant 0 : index
    %17 = vector.load %arg10[%c0_12, %c0_13] : memref<8x32xf32, #tpu.memory_space<vmem>>, vector<8x32xf32>
    tpu.vector_store %arg10[%c0_12, %c0_13], %16 {strides = array<i32>} : memref<8x32xf32, #tpu.memory_space<vmem>>, vector<8x32xf32>,
    %c0_i32_14 = arith.constant 0 : i32
    %18 = arith.cmpi eq, %arg1, %c0_i32_14 : i32
    %19 = arith.extui %18 : i1 to i32
    %c0_i32_15 = arith.constant 0 : i32
    %20 = arith.cmpi ne, %19, %c0_i32_15 : i32
    scf.if %20 {
      %c0_16 = arith.constant 0 : index
      %c0_17 = arith.constant 0 : index
      %21 = vector.load %arg10[%c0_16, %c0_17] : memref<8x32xf32, #tpu.memory_space<vmem>>, vector<8x32xf32>
      %22 = arith.addf %3, %21 : vector<8x32xf32>
      %c0_18 = arith.constant 0 : index
      %c0_19 = arith.constant 0 : index
      %23 = vector.load %arg6[%c0_18, %c0_19] : memref<1x32xf32, #tpu.memory_space<vmem>>, vector<1x32xf32>
      %24 = vector.broadcast %23 : vector<1x32xf32> to vector<8x32xf32>
      %25 = arith.addf %22, %24 : vector<8x32xf32>
      %c0_20 = arith.constant 0 : index
      %c0_21 = arith.constant 0 : index
      %26 = vector.load %arg7[%c0_20, %c0_21] : memref<1x32xf32, #tpu.memory_space<vmem>>, vector<1x32xf32>
      %c0_22 = arith.constant 0 : index
      %c0_23 = arith.constant 0 : index
      %27 = vector.load %arg8[%c0_22, %c0_23] : memref<1x32xf32, #tpu.memory_space<vmem>>, vector<1x32xf32>
      %cst_24 = arith.constant dense<0.000000e+00> : vector<8xf32>
      %28 = vector.multi_reduction <add>, %25, %cst_24 [1] : vector<8x32xf32> to vector<8xf32>
      %29 = vector.shape_cast %28 : vector<8xf32> to vector<8x1xf32>
      %cst_25 = arith.constant 3.200000e+01 : f32
      %30 = vector.broadcast %cst_25 : f32 to vector<8x1xf32>
      %31 = arith.divf %29, %30 : vector<8x1xf32>
      %32 = vector.broadcast %31 : vector<8x1xf32> to vector<8x32xf32>
      %33 = arith.subf %25, %32 : vector<8x32xf32>
      %34 = arith.mulf %33, %33 : vector<8x32xf32>
      %cst_26 = arith.constant dense<0.000000e+00> : vector<8xf32>
      %35 = vector.multi_reduction <add>, %34, %cst_26 [1] : vector<8x32xf32> to vector<8xf32>
      %36 = vector.shape_cast %35 : vector<8xf32> to vector<8x1xf32>
      %cst_27 = arith.constant 3.200000e+01 : f32
      %37 = vector.broadcast %cst_27 : f32 to vector<8x1xf32>
      %38 = arith.divf %36, %37 : vector<8x1xf32>
      %39 = vector.broadcast %31 : vector<8x1xf32> to vector<8x32xf32>
      %40 = arith.subf %25, %39 : vector<8x32xf32>
      %cst_28 = arith.constant 9.99999974E-6 : f32
      %41 = vector.broadcast %cst_28 : f32 to vector<8x1xf32>
      %42 = arith.addf %38, %41 : vector<8x1xf32>
      %43 = math.rsqrt %42 : vector<8x1xf32>
      %44 = vector.broadcast %43 : vector<8x1xf32> to vector<8x32xf32>
      %45 = arith.mulf %40, %44 : vector<8x32xf32>
      %46 = vector.broadcast %26 : vector<1x32xf32> to vector<8x32xf32>
      %47 = arith.mulf %45, %46 : vector<8x32xf32>
      %48 = vector.broadcast %27 : vector<1x32xf32> to vector<8x32xf32>
      %49 = arith.addf %47, %48 : vector<8x32xf32>
      %c0_29 = arith.constant 0 : index
      %c0_30 = arith.constant 0 : index
      %50 = vector.load %arg9[%c0_29, %c0_30] : memref<8x32xf32, #tpu.memory_space<vmem>>, vector<8x32xf32>
      tpu.vector_store %arg9[%c0_29, %c0_30], %49 {strides = array<i32>} : memref<8x32xf32, #tpu.memory_space<vmem>>, vector<8x32xf32>,
    } else {
    }
    return
  }
  func.func @transform_0(%arg0: i32, %arg1: i32) -> (i32, i32) {
    %c0_i32 = arith.constant 0 : i32
    %c0_i32_0 = arith.constant 0 : i32
    return %arg0, %c0_i32 : i32, i32
  }
  func.func @transform_1(%arg0: i32, %arg1: i32) -> (i32, i32) {
    %c0_i32 = arith.constant 0 : i32
    %c0_i32_0 = arith.constant 0 : i32
    return %c0_i32, %arg1 : i32, i32
  }
  func.func @transform_2(%arg0: i32, %arg1: i32) -> (i32, i32) {
    %c0_i32 = arith.constant 0 : i32
    %c0_i32_0 = arith.constant 0 : i32
    return %c0_i32, %arg1 : i32, i32
  }
  func.func @transform_3(%arg0: i32, %arg1: i32) -> (i32, i32) {
    %c0_i32 = arith.constant 0 : i32
    %c0_i32_0 = arith.constant 0 : i32
    return %arg1, %c0_i32 : i32, i32
  }
  func.func @transform_4(%arg0: i32, %arg1: i32) -> (i32, i32) {
    %c0_i32 = arith.constant 0 : i32
    %c0_i32_0 = arith.constant 0 : i32
    %c0_i32_1 = arith.constant 0 : i32
    return %c0_i32, %c0_i32_0 : i32, i32
  }
  func.func @transform_5(%arg0: i32, %arg1: i32) -> (i32, i32) {
    %c0_i32 = arith.constant 0 : i32
    %c0_i32_0 = arith.constant 0 : i32
    %c0_i32_1 = arith.constant 0 : i32
    return %c0_i32, %c0_i32_0 : i32, i32
  }
  func.func @transform_6(%arg0: i32, %arg1: i32) -> (i32, i32) {
    %c0_i32 = arith.constant 0 : i32
    %c0_i32_0 = arith.constant 0 : i32
    %c0_i32_1 = arith.constant 0 : i32
    return %c0_i32, %c0_i32_0 : i32, i32
  }
  func.func @transform_7(%arg0: i32, %arg1: i32) -> (i32, i32) {
    %c0_i32 = arith.constant 0 : i32
    %c0_i32_0 = arith.constant 0 : i32
    return %arg0, %c0_i32 : i32, i32
  }
}

</mosaic_0001>

<bundles_post_ra>
// kernel: tpu_custom_call.1
= control target key start
LH: loop header
LB: loop body
LE: loop exit
PB: predicated region body
PF: predicated region fallthrough
CT: control target
= control target key end

     0   :  { %6 = vsyncpa [#allocation3], 0  ;;  %s286_s0 = inlined_call_operand.hbm [shape: f32[8,128], index: 0, kind: input, shape index: {}]   ;;  %s287_s1 = inlined_call_operand.hbm [shape: f32[8,128], index: 1, kind: output, shape index: {}]  }
   0x1   :  { %7 = vsyncpa [#allocation4], 0  ;;  %s269_s6 = smov 0  }
   0x2 LB: > { %s148_s7 = sadd.s32 4294967295, %s255_s6   ;;  %p149_p0 = scmp.ge.s32.totalorder %s255_s6, 1  ;;  %s255_s6 = sphi %s269_s6, %s13_s6  }
   0x3   : > { %p60_p1 = scmp.lt.s32.totalorder %s255_s6, 3  ;;  %s72_s10 = sshll.u32 %s286_s0, 4  ;;  %s73_s10 = int_to_ptr.hbm [resolvable:$true] %s72_s10 }
   0x4   : > { %p169_p3 = scmp.eq.s32.totalorder %s148_s7, 0  ;;  %s257_s11 = smov [#allocation2]  }
   0x5   : > { %p61_p2 = pnand %p149_p0, %p60_p1  ;;  %s74_s12 = sshll.u32 %s257_s11, 4  ;;  %s75_s12 = int_to_ptr.vmem [resolvable:$true] %s74_s12 }
   0x7   : > { %p165_p4 = pneg %p61_p2  ;;  %87 = sbr.rel (%p61_p2) target bundleno = 19 (0x13), region = 24 }
   0x9   : > { %p166_p5 = pnand %p169_p3, %p165_p4 }
   0xb   : > { %168 = dma.hbm_to_vmem [thread:$0]  (!%p166_p5), %s73_s10, 128, %s75_s12, [#allocation3]  }
   0xc   : > { %246 = dma.done.wait (%p169_p3), [#allocation3], 128  }
   0xd   : > { %248 = vsyncadd (%p169_p3), [#allocation3], 4294967168  ;;  %s258_s13 = smov [#allocation5]   ;;  %s108_s17 = sshll.u32 %s287_s1, 4  ;;  %v98_v0 = vld [vmem:[#allocation2] sm:$0xff]  ;;  %s109_s17 = int_to_ptr.hbm [resolvable:$true] %s108_s17 }
   0xe   : > { %s106_s14 = sshll.u32 %s258_s13, 4  ;;  %p171_p6 = scmp.eq.s32.totalorder %s148_s7, 1  ;;  %99 = vst [vmem:[#allocation5] sm:$0xff] %v98_v0  ;;  %s107_s14 = int_to_ptr.vmem [resolvable:$true] %s106_s14 }
  0x10   : > { %162 = dma.vmem_to_hbm [thread:$0]  (%p171_p6), %s107_s14, 128, %s109_s17, [#allocation4]  }
  0x11   : > { %250 = dma.done.wait (%p171_p6), [#allocation4], 128  }
  0x12   : > { %252 = vsyncadd (%p171_p6), [#allocation4], 4294967168 }
  0x13 PF: > { %s13_s6 = sadd.s32 1, %s255_s6  }
  0x14   : > { %p10_p7 = scmp.ge.s32.totalorder %s13_s6, 4  }
  0x16   :  { %12 = sbr.rel (!%p10_p7) target bundleno = 2 (0x2), region = 53 }
  0x1b   :  { %122 = vsyncpa [#allocation3], 1 }
  0x1c   :  { %124 = vsyncpa [#allocation3 + $0x1], 1 }
  0x1d   :  { %125 = vsyncpa [#allocation4], 1 }
  0x1e   :  { %127 = vsyncpa [#allocation4 + $0x1], 1 }

// kernel: decoder_forward.16
= control target key start
LH: loop header
LB: loop body
LE: loop exit
PB: predicated region body
PF: predicated region fallthrough
CT: control target
= control target key end

     0   :  { %s690_s30 = smov 0   ;;  %s740_s0 = inlined_call_operand.vmem [shape: f32[16,32], index: 0, kind: input, shape index: {}]   ;;  %s741_s1 = inlined_call_operand.vmem [shape: bf16[32,32], index: 1, kind: input, shape index: {}]   ;;  %s742_s2 = inlined_call_operand.vmem [shape: f32[1,32], index: 2, kind: input, shape index: {}]   ;;  %s743_s3 = inlined_call_operand.vmem [shape: bf16[32,32], index: 3, kind: input, shape index: {}]   ;;  %s744_s4 = inlined_call_operand.vmem [shape: f32[1,32], index: 4, kind: input, shape index: {}]   ;;  %s745_s5 = inlined_call_operand.vmem [shape: bf16[32,32], index: 5, kind: input, shape index: {}]   ;;  %s746_s6 = inlined_call_operand.vmem [shape: f32[1,32], index: 6, kind: input, shape index: {}]   ;;  %s747_s7 = inlined_call_operand.vmem [shape: bf16[16,32], index: 7, kind: output, shape index: {0}]   ;;  %s748_s8 = inlined_call_operand.vmem [shape: bf16[16,32], index: 8, kind: output, shape index: {1}]   ;;  %s749_s9 = inlined_call_operand.vmem [shape: bf16[16,32], index: 9, kind: output, shape index: {2}]  }
   0x1 LB: > { %s577_s10 = sadd.s32 4294967295, %s638_s30   ;;  %p581_p0 = scmp.ge.s32.totalorder %s638_s30, 1  ;;  %s638_s30 = sphi %s690_s30, %s20_s30  }
   0x2   : > { %p291_p1 = scmp.lt.s32.totalorder %s638_s30, 3 }
   0x4   : > { %p292_p2 = pnand %p581_p0, %p291_p1 }
   0x5   : > { %p333_p3 = scmp.lt.s32.totalorder (!%p292_p2), %s577_s10, 1 }
   0x6   : > { %295 = sbr.rel (%p292_p2) target bundleno = 161 (0xa1), region = 48 }
   0xb   : > { %v616_v0 = vld [vmem:[%s741_s1 + $0x8] sm:$0xff]  ;;  %v615_v3 = vld [vmem:[%s741_s1] sm:$0xff]  ;;  %s751_s10 = smov (!%p333_p3, %s577_s10), 1  ;;  %vm372_vm0 = vcmask 261120   ;;  %vm390_vm1 = vcmask 257024  }
   0xc   : > { %v618_v1 = vld [vmem:[%s743_s3 + $0x8] sm:$0xff]  ;;  %382 = vmatpush.bf16.msra.mxu0 %v616_v0  ;;  %v617_v4 = vld [vmem:[%s743_s3] sm:$0xff]  ;;  %s582_s23 = sshll.u32 %s751_s10, 3  ;;  %s583_s12 = sshll.u32 %s751_s10, 2 }
   0xd   : > { %v620_v2 = vld [vmem:[%s745_s5 + $0x8] sm:$0xff]  ;;  %418 = vmatpush.bf16.msra.mxu1 %v618_v1  ;;  %v619_v5 = vld [vmem:[%s745_s5] sm:$0xff]  ;;  %s336_s26 = scalar_lea.vmem %s740_s0, %s582_s23  ;;  %s340_s15 = scalar_lea.vmem %s747_s7, %s583_s12 }
   0xe   : > { %453 = vmatpush.bf16.msra.mxu2 %v620_v2  ;;  %v350_v6 = vld [vmem:[%s336_s26] sm:$0xff]  ;;  %s344_s18 = scalar_lea.vmem %s748_s8, %s583_s12  ;;  %s348_s22 = scalar_lea.vmem %s749_s9, %s583_s12 }
   0xf   : > { %v351_v7 = vpack.c.bf16 %v350_v6, %v350_v6  ;;  %v629_v8 = vld [vmem:[%s742_s2] ss:$0 sm:$0xff] }
  0x10   : > { %383 = vmatpush.bf16.msra.mxu0 %v615_v3  ;;  %v630_v9 = vld [vmem:[%s744_s4] ss:$0 sm:$0xff] }
  0x11   : > { %419 = vmatpush.bf16.msra.mxu1 %v617_v4  ;;  %v631_v16 = vld [vmem:[%s746_s6] ss:$0 sm:$0xff] }
  0x12   : > { %454 = vmatpush.bf16.msra.mxu2 %v619_v5 }
  0x13   : > { %594 = vmatmul.msk.bf16.vlgmr.msra.gmra.mxu0 %vm372_vm0, %v351_v7 }
  0x14   : > { %603 = vmatmul.msk.bf16.vlgmr.msra.gmra.mxu1 %vm372_vm0, %v351_v7 }
  0x15   : > { %612 = vmatmul.msk.bf16.vlgmr.msra.gmra.mxu2 %vm372_vm0, %v351_v7 }
  0x90   : > { %v385_v10 = vpop.f32.mrf.mxu0 }
  0x91   : > { %v421_v11 = vpop.f32.mrf.mxu1  ;;  %v386_v12 = vadd.f32 %v629_v8, %v385_v10 }
  0x92   : > { %v422_v13 = vadd.f32 %v630_v9, %v421_v11 }
  0x93   : > { %v389_v14 = vpack.c.bf16 %v386_v12, %v386_v12 }
  0x94   : > { %v425_v15 = vpack.c.bf16 %v422_v13, %v422_v13 }
  0x95   : > { %391 = vst.msk [vmem:[%s340_s15] sm:$0xf] %vm390_vm1, %v389_v14 }
  0x96   : > { %426 = vst.msk [vmem:[%s344_s18] sm:$0xf] %vm390_vm1, %v425_v15 }
  0x98   : > { %v456_v17 = vpop.f32.mrf.mxu2  ;;  %v387_v19 = vpop.f32.mrf.mxu0 }
  0x99   : > { %v457_v18 = vadd.f32 %v631_v16, %v456_v17  ;;  %v423_v20 = vpop.f32.mrf.mxu1 }
  0x9b   : > { %v460_v21 = vpack.c.bf16 %v457_v18, %v457_v18 }
  0x9d   : > { %461 = vst.msk [vmem:[%s348_s22] sm:$0xf] %vm390_vm1, %v460_v21 }
  0xa0   : > { %v458_v22 = vpop.f32.mrf.mxu2 }
  0xa1 PF: > { %s20_s30 = sadd.s32 1, %s638_s30  }
  0xa2   : > { %p17_p4 = scmp.ge.s32.totalorder %s20_s30, 4  }
  0xa4   :  { %19 = sbr.rel (!%p17_p4) target bundleno = 1 (0x1), region = 102 }

// kernel: decoder_forward.19
= control target key start
LH: loop header
LB: loop body
LE: loop exit
PB: predicated region body
PF: predicated region fallthrough
CT: control target
= control target key end

     0   :  { %s319_s12 = smov 0   ;;  %s345_s0 = inlined_call_operand.vmem [shape: f32[16,32], index: 0, kind: input, shape index: {}]   ;;  %s346_s1 = inlined_call_operand.vmem [shape: bf16[32,32], index: 1, kind: input, shape index: {}]   ;;  %s347_s2 = inlined_call_operand.vmem [shape: f32[1,32], index: 2, kind: input, shape index: {}]   ;;  %s348_s3 = inlined_call_operand.vmem [shape: bf16[16,32], index: 3, kind: output, shape index: {}]  }
   0x1 LB: > { %s262_s13 = sadd.s32 4294967295, %s297_s12   ;;  %p266_p0 = scmp.ge.s32.totalorder %s297_s12, 1  ;;  %s297_s12 = sphi %s319_s12, %s13_s12  }
   0x2   : > { %p136_p1 = scmp.lt.s32.totalorder %s297_s12, 3 }
   0x4   : > { %p137_p2 = pnand %p266_p0, %p136_p1 }
   0x5   : > { %p158_p3 = scmp.lt.s32.totalorder (!%p137_p2), %s262_s13, 1 }
   0x6   : > { %140 = sbr.rel (%p137_p2) target bundleno = 153 (0x99), region = 32 }
   0xb   : > { %v281_v0 = vld [vmem:[%s346_s1 + $0x8] sm:$0xff]  ;;  %v280_v1 = vld [vmem:[%s346_s1] sm:$0xff]  ;;  %s350_s13 = smov (!%p158_p3, %s262_s13), 1  ;;  %vm189_vm0 = vcmask 261120   ;;  %vm207_vm1 = vcmask 257024  }
   0xc   : > { %199 = vmatpush.bf16.msra.mxu0 %v281_v0  ;;  %s267_s18 = sshll.u32 %s350_s13, 3  ;;  %v290_v4 = vld [vmem:[%s347_s2] ss:$0 sm:$0xff]  ;;  %s268_s24 = sshll.u32 %s350_s13, 2 }
   0xd   : > { %s161_s21 = scalar_lea.vmem %s345_s0, %s267_s18  ;;  %s165_s27 = scalar_lea.vmem %s348_s3, %s268_s24 }
   0xe   : > { %v167_v2 = vld [vmem:[%s161_s21] sm:$0xff] }
   0xf   : > { %v168_v3 = vpack.c.bf16 %v167_v2, %v167_v2 }
  0x10   : > { %200 = vmatpush.bf16.msra.mxu0 %v280_v1 }
  0x13   : > { %277 = vmatmul.msk.bf16.vlgmr.msra.gmra.mxu0 %vm189_vm0, %v168_v3 }
  0x90   : > { %v202_v5 = vpop.f32.mrf.mxu0 }
  0x91   : > { %v203_v6 = vadd.f32 %v290_v4, %v202_v5 }
  0x93   : > { %v206_v7 = vpack.c.bf16 %v203_v6, %v203_v6 }
  0x95   : > { %208 = vst.msk [vmem:[%s165_s27] sm:$0xf] %vm207_vm1, %v206_v7 }
  0x98   : > { %v204_v8 = vpop.f32.mrf.mxu0 }
  0x99 PF: > { %s13_s12 = sadd.s32 1, %s297_s12  }
  0x9a   : > { %p10_p4 = scmp.ge.s32.totalorder %s13_s12, 4  }
  0x9c   :  { %12 = sbr.rel (!%p10_p4) target bundleno = 1 (0x1), region = 62 }

// kernel: decoder_forward.18
= control target key start
LH: loop header
LB: loop body
LE: loop exit
PB: predicated region body
PF: predicated region fallthrough
CT: control target
= control target key end

     0   :  { %s491_s21 = smov 0   ;;  %s538_s0 = inlined_call_operand.vmem [shape: bf16[16,32], index: 0, kind: input, shape index: {}]   ;;  %s539_s1 = inlined_call_operand.vmem [shape: bf16[32,32], index: 1, kind: input, shape index: {}]   ;;  %s540_s2 = inlined_call_operand.vmem [shape: f32[1,32], index: 2, kind: input, shape index: {}]   ;;  %s541_s3 = inlined_call_operand.vmem [shape: f32[16,32], index: 3, kind: input, shape index: {}]   ;;  %s542_s4 = inlined_call_operand.vmem [shape: f32[1,32], index: 4, kind: input, shape index: {}]   ;;  %s543_s5 = inlined_call_operand.vmem [shape: f32[1,32], index: 5, kind: input, shape index: {}]   ;;  %s544_s6 = inlined_call_operand.vmem [shape: f32[16,32], index: 6, kind: output, shape index: {}]  }
   0x1 LB: > { %s410_s22 = sadd.s32 4294967295, %s453_s21   ;;  %p414_p0 = scmp.ge.s32.totalorder %s453_s21, 1  ;;  %s453_s21 = sphi %s491_s21, %s16_s21  }
   0x2   : > { %p220_p1 = scmp.lt.s32.totalorder %s453_s21, 3 }
   0x4   : > { %p221_p2 = pnand %p414_p0, %p220_p1 }
   0x5   : > { %p252_p3 = scmp.lt.s32.totalorder (!%p221_p2), %s410_s22, 1 }
   0x6   : > { %224 = sbr.rel (%p221_p2) target bundleno = 418 (0x1a2), region = 44 }
   0xb   : > { %v430_v0 = vld [vmem:[%s539_s1 + $0x8] sm:$0xff]  ;;  %v429_v1 = vld [vmem:[%s539_s1] sm:$0xff]  ;;  %s546_s22 = smov (!%p252_p3, %s410_s22), 1  ;;  %vm286_vm0 = vcmask 261120   ;;  %v455_v10 = vmov 32.0  }
   0xc   : > { %296 = vmatpush.bf16.msra.mxu0 %v430_v0  ;;  %s415_s27 = sshll.u32 %s546_s22, 2  ;;  %s416_s7 = sshll.u32 %s546_s22, 3  ;;  %v440_v3 = vld [vmem:[%s540_s2] ss:$0 sm:$0xff]  ;;  %443 = vrcp.f32 %v455_v10 }
   0xd   : > { %s255_s30 = scalar_lea.vmem %s538_s0, %s415_s27  ;;  %s259_s12 = scalar_lea.vmem %s541_s3, %s416_s7  ;;  %v441_v31 = vld [vmem:[%s542_s4] ss:$0 sm:$0xff] }
   0xe   : > { %v265_v2 = vld [vmem:[%s255_s30] sm:$0xf]  ;;  %s263_s19 = scalar_lea.vmem %s544_s6, %s416_s7 }
   0xf   : > { %v303_v5 = vld [vmem:[%s259_s12] sm:$0xff] }
  0x10   : > { %297 = vmatpush.bf16.msra.mxu0 %v429_v1  ;;  %v442_v33 = vld [vmem:[%s543_s5] ss:$0 sm:$0xff] }
  0x12   : > { %v444_v11 = vpop.eup %443 }
  0x13   : > { %426 = vmatmul.msk.bf16.vlgmr.msra.gmra.mxu0 %vm286_vm0, %v265_v2  ;;  %v311_v12 = vmul.f32 32.0, %v444_v11  ;;  %vm315_vm1 = vweird.f32 %v444_v11 }
  0x15   : > { %v312_v13 = vsub.f32 1.0, %v311_v12 }
  0x17   : > { %v313_v14 = vmul.f32 %v444_v11, %v312_v13 }
  0x19   : > { %v314_v15 = vadd.f32 %v444_v11, %v313_v14 }
  0x1b   : > { %v316_v16 = vsel %vm315_vm1, %v444_v11, %v314_v15 }
  0x90   : > { %v299_v4 = vpop.f32.mrf.mxu0 }
  0x91   : > { %v300_v6 = vadd.f32 %v440_v3, %v299_v4 }
  0x93   : > { %v304_v7 = vadd.f32 %v303_v5, %v300_v6 }
  0x95   : > { %v307_v8 = vsel %vm286_vm0, %v304_v7, 0.0 }
  0x96   : > { %308 = vadd.xlane.f32.xlu0 %v307_v8 }
  0x98   : > { %v301_v9 = vpop.f32.mrf.mxu0 }
 0x109   : > { %v309_v17 = vpop.xlane.xlu0 %308 }
 0x10a   : > { %v317_v18 = vmul.f32 %v316_v16, %v309_v17 }
 0x10c   : > { %v318_v19 = vsub.f32 %v304_v7, %v317_v18 }
 0x10e   : > { %v319_v20 = vmul.f32 %v318_v19, %v318_v19 }
 0x110   : > { %v320_v21 = vsel %vm286_vm0, %v319_v20, 0.0 }
 0x111   : > { %321 = vadd.xlane.f32.xlu0 %v320_v21 }
 0x184   : > { %v322_v22 = vpop.xlane.xlu0 %321 }
 0x185   : > { %v323_v23 = vmul.f32 %v322_v22, %v316_v16 }
 0x187   : > { %v324_v24 = vadd.f32 1e-05, %v323_v23 }
 0x189   : > { %445 = vrsqrt.f32 %v324_v24  ;;  %vm331_vm3 = vweird.f32 %v324_v24 }
 0x18f   : > { %v446_v25 = vpop.eup %445 }
 0x190   : > { %v326_v26 = vmul.f32 %v446_v25, %v324_v24  ;;  %vm332_vm2 = vweird.f32 %v446_v25 }
 0x191   : > { %vm333_vm4 = vmor %vm331_vm3, %vm332_vm2 }
 0x192   : > { %v327_v27 = vmul.f32 %v446_v25, %v326_v26 }
 0x194   : > { %v328_v28 = vmul.f32 0.5, %v327_v27 }
 0x196   : > { %v329_v29 = vsub.f32 1.5, %v328_v28 }
 0x198   : > { %v330_v30 = vmul.f32 %v446_v25, %v329_v29 }
 0x19a   : > { %v334_v32 = vsel %vm333_vm4, %v446_v25, %v330_v30 }
 0x19b   : > { %v335_v34 = vmul.f32 %v334_v32, %v318_v19 }
 0x19d   : > { %v339_v35 = vmul.f32 %v441_v31, %v335_v34 }
 0x19f   : > { %v343_v36 = vadd.f32 %v442_v33, %v339_v35 }
 0x1a1   : > { %344 = vst.msk [vmem:[%s263_s19] sm:$0xff] %vm286_vm0, %v343_v36 }
 0x1a2 PF: > { %s16_s21 = sadd.s32 1, %s453_s21  }
 0x1a3   : > { %p13_p4 = scmp.ge.s32.totalorder %s16_s21, 4  }
 0x1a5   :  { %15 = sbr.rel (!%p13_p4) target bundleno = 1 (0x1), region = 77 }

// kernel: decoder_forward.17
= control target key start
LH: loop header
LB: loop body
LE: loop exit
PB: predicated region body
PF: predicated region fallthrough
CT: control target
= control target key end

     0   :  { %s965_s0 = inlined_call_operand.vmem [shape: bf16[8,8,8], index: 0, kind: input, shape index: {}]   ;;  %s966_s1 = inlined_call_operand.vmem [shape: bf16[8,8,8], index: 1, kind: input, shape index: {}]   ;;  %s967_s2 = inlined_call_operand.vmem [shape: bf16[8,8,8], index: 2, kind: input, shape index: {}]   ;;  %s968_s3 = inlined_call_operand.vmem [shape: bf16[2,8,8], index: 3, kind: input, shape index: {}]   ;;  %s969_s4 = inlined_call_operand.vmem [shape: bf16[8,8,8], index: 4, kind: output, shape index: {0}]   ;;  %s970_s5 = inlined_call_operand.hbm [shape: f32[8,8,8], index: 5, kind: output, shape index: {1}]  }
   0x1   :  { %971 = sst [smem:[#allocation5_spill]] %s965_s0 }
   0x2   :  { %11 = vsyncpa [#allocation3], 0 }
   0x3   :  { %13 = vsyncpa [#allocation3 + $0x1], 0  ;;  %s839_s18 = smov 0   ;;  %s841_s19 = smov 0  }
   0x4   :  { %s843_s20 = smov 0   ;;  %s845_s21 = smov 0  }
   0x5   :  { %s847_s22 = smov 0   ;;  %s849_s23 = smov 0  }
   0x6 LB: > { %s633_s24 = sadd.s32 4294967295, %s805_s23   ;;  %s634_s25 = sadd.s32 4294967294, %s805_s23   ;;  %s805_s23 = sphi %s849_s23, %s19_s23   ;;  %s801_s22 = sphi %s847_s22, %s979_s22   ;;  %s797_s21 = sphi %s845_s21, %s978_s21   ;;  %s793_s20 = sphi %s843_s20, %s977_s20   ;;  %s789_s19 = sphi %s841_s19, %s976_s19   ;;  %s785_s18 = sphi %s839_s18, %s975_s18  }
   0x7   : > { %s31_s26 = sadd.s32 1, %s801_s22  ;;  %s174_s27 = sadd.s32 1, %s793_s20 }
   0x8   : > { %p33_p0 = scmp.ge.s32.totalorder %s31_s26, 4  ;;  %p184_p1 = scmp.ne.s32.totalorder %s793_s20, %s789_s19 }
   0x9   : > { %p185_p2 = scmp.eq.s32.totalorder %s633_s24, 3  ;;  %p190_p3 = scmp.ne.s32.totalorder %s789_s19, %s785_s18 }
   0xa   : > { %s981_s26 = smov (%p33_p0, %s31_s26), 0  ;;  %p191_p5 = scmp.eq.s32.totalorder %s634_s25, 3 }
   0xb   : > { %p879_p4 = por %p185_p2, %p184_p1  ;;  %s169_s29 = ssub.s32 %s801_s22, %s981_s26 }
   0xc   : > { %p638_p6 = scmp.ge.s32.totalorder %s805_s23, 1  ;;  %p172_p7 = scmp.eq.s32.totalorder %s169_s29, 0 }
   0xd   : > { %p886_p8 = por %p191_p5, %p190_p3  ;;  %p246_p9 = scmp.lt.s32.totalorder %s805_s23, 5 }
   0xe   : > { %s892_s6 = scalar_select %p172_p7, %s793_s20, %s174_s27  }
   0xf   : > { %p247_p10 = pnand %p638_p6, %p246_p9 }
  0x10   : > { %s640_s7 = sshll.u32 (!%p247_p10), %s797_s21, 1  ;;  %s974_s0 = sld [smem:[#allocation5_spill]] (!%p247_p10) }
  0x11   : > { %250 = sbr.rel (%p247_p10) target bundleno = 568 (0x238), region = 36  ;;  %p300_p11 = scmp.lt.s32.totalorder (!%p247_p10), %s640_s7, 7 }
  0x12   : > { %s296_s27 = sand.u32 (!%p247_p10), 1, %s789_s19   ;;  %s657_s9 = sshll.u32 (!%p247_p10), %s797_s21, 4 }
  0x13   : > { %s639_s29 = sshll.u32 (!%p247_p10), %s296_s27, 4  ;;  %s483_s12 = scalar_lea.hbm (!%p247_p10), %s970_s5, %s657_s9 }
  0x14   : > { %s467_s15 = scalar_lea.sflag (!%p247_p10), [#allocation3], %s296_s27  ;;  %s747_s21 = scalar_lea.hbm (!%p247_p10), %s970_s5, 64 }
  0x16   : > { %s983_s7 = smov (!%p300_p11, %s640_s7), 7  ;;  %vm343_vm0 = vcmask 64512   ;;  %v659_v6 = vld [vmem:[%s968_s3] sm:$0xff]   ;;  %vm417_vm1 = vcmask 1043456  }
  0x17   : > { %s895_s8 = sshll.u32 %s983_s7, 2  ;;  %v660_v7 = vunpack.c.l.bf16 %v659_v6  ;;  %v661_v13 = vunpack.c.h.bf16 %v659_v6  ;;  %s298_s7 = scalar_lea.vmem [#allocation2], %s639_s29 }
  0x18   : > { %s312_s11 = scalar_lea.vmem %s966_s1, %s895_s8  ;;  %s306_s14 = scalar_lea.vmem %s974_s0, %s895_s8 }
  0x19   : > { %v337_v0 = vld [vmem:[%s312_s11] sm:$0xf]  ;;  %v338_v1 = vld [vmem:[%s312_s11 + $0x4] sm:$0xf]  ;;  %s318_s25 = scalar_lea.vmem %s967_s2, %s895_s8  ;;  %s484_s13 = sshll.u32 %s298_s7, 4  ;;  %s485_s13 = int_to_ptr.vmem [resolvable:$true] %s484_s13 }
  0x1a   : > { %v348_v2 = vsel %vm343_vm0, %v337_v0, 0  ;;  %v367_v3 = vsel %vm343_vm0, %v338_v1, 0  ;;  %v335_v4 = vld [vmem:[%s306_s14] sm:$0xf]  ;;  %v336_v5 = vld [vmem:[%s306_s14 + $0x4] sm:$0xf] }
  0x1b   : > { %357 = vmatpush.bf16.xpose.msra.mxu0 %v348_v2  ;;  %376 = vmatpush.bf16.xpose.msra.mxu1 %v367_v3  ;;  %v339_v29 = vld [vmem:[%s318_s25] sm:$0xf]  ;;  %v340_v31 = vld [vmem:[%s318_s25 + $0x4] sm:$0xf]  ;;  %s486_s14 = sshll.u32 %s483_s12, 4  ;;  %s487_s14 = int_to_ptr.hbm [resolvable:$true] %s486_s14 }
  0x1c   : > { %v419_v30 = vsel %vm417_vm1, %v339_v29, 0  ;;  %v438_v32 = vsel %vm417_vm1, %v340_v31, 0  ;;  %s741_s16 = sshra.s32 %s487_s14, 4  ;;  %s742_s16 = int_to_ptr.hbm [resolvable:$true] %s741_s16 }
  0x1d   : > { %428 = vmatpush.bf16.msra.mxu2 %v419_v30  ;;  %447 = vmatpush.bf16.msra.mxu3 %v438_v32  ;;  %s743_s17 = scalar_lea.hbm %s742_s16, 16  ;;  %p748_p1 = scmp.lt.s32.totalorder %s742_s16, %s970_s5 }
  0x1e   : > { %p744_p12 = scmp.ne.s32.totalorder %s742_s16, %s743_s17  ;;  %p749_p2 = scmp.lt.s32.totalorder %s747_s21, %s743_s17 }
  0x20   : > { %p745_p13 = pnand %p744_p12, %p879_p4  ;;  %p750_p3 = por %p749_p2, %p748_p1 }
  0x22   : > { %648 = vmatmul.msk.bf16.vlgmr.msra.gmra.mxu0 %vm343_vm0, %v335_v4  ;;  %649 = vmatmul.msk.bf16.vlgmr.msra.gmra.mxu1 %vm343_vm0, %v336_v5  ;;  %p746_p0 = pneg %p745_p13 }
  0x24   : > { %p751_p5 = pnand %p750_p3, %p746_p0 }
  0x9f   : > { %v359_v8 = vpop.f32.mrf.mxu0  ;;  %v378_v9 = vpop.f32.mrf.mxu1 }
  0xa0   : > { %v382_v10 = vmul.f32 0.35355338, %v359_v8  ;;  %v383_v11 = vmul.f32 0.35355338, %v378_v9 }
  0xa2   : > { %v386_v12 = vadd.f32 %v660_v7, %v382_v10  ;;  %v387_v15 = vadd.f32 %v661_v13, %v383_v11 }
  0xa4   : > { %v388_v14 = vsel %vm343_vm0, %v386_v12, -inf  ;;  %v391_v18 = vsel %vm343_vm0, %v387_v15, -inf }
  0xa5   : > { %389 = vmax.xlane.f32.xlu0 %v388_v14 }
  0xa7   : > { %v361_v16 = vpop.f32.mrf.mxu0  ;;  %v380_v17 = vpop.f32.mrf.mxu1 }
  0xad   : > { %392 = vmax.xlane.f32.xlu0 %v391_v18 }
 0x118   : > { %v390_v19 = vpop.xlane.xlu0 %389 }
 0x119   : > { %v394_v20 = vsub.f32 %v386_v12, %v390_v19 }
 0x11b   : > { %v396_v21 = vmul.f32 1.442695, %v394_v20 }
 0x11d   : > { %719 = vpow2.f32 %v396_v21 }
 0x120   : > { %v393_v22 = vpop.xlane.xlu0 %392 }
 0x121   : > { %v395_v23 = vsub.f32 %v387_v15, %v393_v22 }
 0x123   : > { %v720_v24 = vpop.eup %719  ;;  %v398_v25 = vmul.f32 1.442695, %v395_v23 }
 0x124   : > { %v400_v26 = vsel %vm343_vm0, %v720_v24, 0.0 }
 0x125   : > { %721 = vpow2.f32 %v398_v25  ;;  %401 = vadd.xlane.f32.xlu1 %v400_v26 }
 0x12b   : > { %v722_v27 = vpop.eup %721 }
 0x12c   : > { %v403_v28 = vsel %vm343_vm0, %v722_v27, 0.0 }
 0x12d   : > { %404 = vadd.xlane.f32.xlu1 %v403_v28 }
 0x198   : > { %v402_v33 = vpop.xlane.xlu1 %401 }
 0x199   : > { %723 = vrcp.f32 %v402_v33 }
 0x19f   : > { %v724_v34 = vpop.eup %723 }
 0x1a0   : > { %v405_v35 = vpop.xlane.xlu1 %404  ;;  %v408_v36 = vmul.f32 %v724_v34, %v720_v24 }
 0x1a1   : > { %725 = vrcp.f32 %v405_v35 }
 0x1a2   : > { %410 = vst.msk [vmem:[%s298_s7] sm:$0xff] %vm343_vm0, %v408_v36  ;;  %v412_v37 = vpack.c.bf16 %v408_v36, %v408_v36 }
 0x1a4   : > { %650 = vmatmul.msk.bf16.vlgmr.msra.gmra.mxu2 %vm343_vm0, %v412_v37 }
 0x1a7   : > { %v726_v38 = vpop.eup %725 }
 0x1a8   : > { %v409_v39 = vmul.f32 %v726_v38, %v722_v27 }
 0x1aa   : > { %411 = vst.msk [vmem:[%s298_s7 + $0x8] sm:$0xff] %vm343_vm0, %v409_v39  ;;  %v413_v40 = vpack.c.bf16 %v409_v39, %v409_v39 }
 0x1ac   : > { %651 = vmatmul.msk.bf16.vlgmr.msra.gmra.mxu3 %vm343_vm0, %v413_v40 }
 0x1ad   : > { %754 = shalt.err (!%p751_p5)
}
 0x1ae   : > { %s807_s27 = smov 128   ;;  %s808_s7 = smov 8   ;;  %vm455_vm2 = vcmask 60416  }
 0x1af   : > { %662 = dma.vmem_to_hbm [thread:$0]  (%p879_p4), %s485_s13, 256, %s487_s14, %s467_s15, %s807_s27, %s807_s27, %s808_s7  }
 0x1b0   : > { %s331_s11 = scalar_lea.vmem %s969_s4, %s895_s8 }
 0x227   : > { %v430_v41 = vpop.f32.mrf.mxu2 }
 0x228   : > { %v453_v42 = vpack.c.bf16 %v430_v41, %v430_v41 }
 0x22a   : > { %456 = vst.msk [vmem:[%s331_s11] sm:$0xf] %vm455_vm2, %v453_v42 }
 0x22f   : > { %v432_v43 = vpop.f32.mrf.mxu2  ;;  %v449_v44 = vpop.f32.mrf.mxu3 }
 0x230   : > { %v454_v45 = vpack.c.bf16 %v449_v44, %v449_v44 }
 0x232   : > { %457 = vst.msk [vmem:[%s331_s11 + $0x4] sm:$0xf] %vm455_vm2, %v454_v45 }
 0x237   : > { %v451_v46 = vpop.f32.mrf.mxu3 }
 0x238 PF: > { %p668_p6 = scmp.ge.s32.totalorder %s805_s23, 2  ;;  %s512_s0 = sand.u32 1, %s785_s18  }
 0x239   : > { %s513_s28 = scalar_lea.sflag [#allocation3], %s512_s0 }
 0x23a   : > { %p665_p4 = pnand %p668_p6, %p886_p8 }
 0x23c   : > { %p666_p7 = pneg %p665_p4 }
 0x23e   : > { %780 = dma.done.wait (%p666_p7), %s513_s28, 256  }
 0x23f   : > { %782 = vsyncadd (%p666_p7), %s513_s28, 4294967040  ;;  %s19_s23 = sadd.s32 1, %s805_s23   ;;  %s975_s18 = smov %s789_s19 }
 0x240   : > { %p16_p9 = scmp.ge.s32.totalorder %s19_s23, 6   ;;  %s976_s19 = smov %s793_s20 }
 0x241   : > { %s977_s20 = smov %s892_s6  ;;  %s978_s21 = smov %s801_s22 }
 0x242   : > { %s979_s22 = smov %s981_s26  ;;  %18 = sbr.rel (!%p16_p9) target bundleno = 6 (0x6), region = 92 }
 0x247   :  { %519 = vsyncpa [#allocation3], 1 }
 0x248   :  { %521 = vsyncpa [#allocation3 + $0x1], 1 }

// kernel: decoder_forward.20
= control target key start
LH: loop header
LB: loop body
LE: loop exit
PB: predicated region body
PF: predicated region fallthrough
CT: control target
= control target key end

     0   :  { %s505_s21 = smov 0   ;;  %s543_s0 = inlined_call_operand.vmem [shape: f32[16,32], index: 0, kind: input, shape index: {}]   ;;  %s544_s1 = inlined_call_operand.vmem [shape: bf16[32,32], index: 1, kind: input, shape index: {}]   ;;  %s545_s2 = inlined_call_operand.vmem [shape: f32[1,32], index: 2, kind: input, shape index: {}]   ;;  %s546_s3 = inlined_call_operand.vmem [shape: bf16[32,32], index: 3, kind: input, shape index: {}]   ;;  %s547_s4 = inlined_call_operand.vmem [shape: f32[1,32], index: 4, kind: input, shape index: {}]   ;;  %s548_s5 = inlined_call_operand.vmem [shape: bf16[16,32], index: 5, kind: output, shape index: {0}]   ;;  %s549_s6 = inlined_call_operand.vmem [shape: bf16[16,32], index: 6, kind: output, shape index: {1}]  }
   0x1 LB: > { %s420_s22 = sadd.s32 4294967295, %s468_s21   ;;  %p424_p0 = scmp.ge.s32.totalorder %s468_s21, 1  ;;  %s468_s21 = sphi %s505_s21, %s17_s21  }
   0x2   : > { %p214_p1 = scmp.lt.s32.totalorder %s468_s21, 3 }
   0x4   : > { %p215_p2 = pnand %p424_p0, %p214_p1 }
   0x5   : > { %p246_p3 = scmp.lt.s32.totalorder (!%p215_p2), %s420_s22, 1 }
   0x6   : > { %218 = sbr.rel (%p215_p2) target bundleno = 154 (0x9a), region = 40 }
   0xb   : > { %v449_v0 = vld [vmem:[%s544_s1 + $0x8] sm:$0xff]  ;;  %v448_v2 = vld [vmem:[%s544_s1] sm:$0xff]  ;;  %s551_s22 = smov (!%p246_p3, %s420_s22), 1  ;;  %vm281_vm0 = vcmask 261120   ;;  %vm299_vm1 = vcmask 257024  }
   0xc   : > { %v451_v1 = vld [vmem:[%s546_s3 + $0x8] sm:$0xff]  ;;  %291 = vmatpush.bf16.msra.mxu0 %v449_v0  ;;  %v450_v3 = vld [vmem:[%s546_s3] sm:$0xff]  ;;  %s425_s7 = sshll.u32 %s551_s22, 3  ;;  %s426_s15 = sshll.u32 %s551_s22, 2 }
   0xd   : > { %327 = vmatpush.bf16.msra.mxu1 %v451_v1  ;;  %s249_s10 = scalar_lea.vmem %s543_s0, %s425_s7  ;;  %v460_v6 = vld [vmem:[%s545_s2] ss:$0 sm:$0xff]  ;;  %s253_s18 = scalar_lea.vmem %s548_s5, %s426_s15 }
   0xe   : > { %v259_v4 = vld [vmem:[%s249_s10] sm:$0xff]  ;;  %s257_s23 = scalar_lea.vmem %s549_s6, %s426_s15 }
   0xf   : > { %v260_v5 = vpack.c.bf16 %v259_v4, %v259_v4  ;;  %v461_v7 = vld [vmem:[%s547_s4] ss:$0 sm:$0xff] }
  0x10   : > { %292 = vmatpush.bf16.msra.mxu0 %v448_v2 }
  0x11   : > { %328 = vmatpush.bf16.msra.mxu1 %v450_v3 }
  0x13   : > { %436 = vmatmul.msk.bf16.vlgmr.msra.gmra.mxu0 %vm281_vm0, %v260_v5 }
  0x14   : > { %445 = vmatmul.msk.bf16.vlgmr.msra.gmra.mxu1 %vm281_vm0, %v260_v5 }
  0x90   : > { %v294_v8 = vpop.f32.mrf.mxu0 }
  0x91   : > { %v330_v9 = vpop.f32.mrf.mxu1  ;;  %v295_v10 = vadd.f32 %v460_v6, %v294_v8 }
  0x92   : > { %v331_v11 = vadd.f32 %v461_v7, %v330_v9 }
  0x93   : > { %v298_v12 = vpack.c.bf16 %v295_v10, %v295_v10 }
  0x94   : > { %v334_v13 = vpack.c.bf16 %v331_v11, %v331_v11 }
  0x95   : > { %300 = vst.msk [vmem:[%s253_s18] sm:$0xf] %vm299_vm1, %v298_v12 }
  0x96   : > { %335 = vst.msk [vmem:[%s257_s23] sm:$0xf] %vm299_vm1, %v334_v13 }
  0x98   : > { %v296_v14 = vpop.f32.mrf.mxu0 }
  0x99   : > { %v332_v15 = vpop.f32.mrf.mxu1 }
  0x9a PF: > { %s17_s21 = sadd.s32 1, %s468_s21  }
  0x9b   : > { %p14_p4 = scmp.ge.s32.totalorder %s17_s21, 4  }
  0x9d   :  { %16 = sbr.rel (!%p14_p4) target bundleno = 1 (0x1), region = 82 }

// kernel: decoder_forward.21
= control target key start
LH: loop header
LB: loop body
LE: loop exit
PB: predicated region body
PF: predicated region fallthrough
CT: control target
= control target key end

     0   :  { %10 = vsyncpa [#allocation3], 0  ;;  %s887_s0 = inlined_call_operand.vmem [shape: bf16[8,8,8], index: 0, kind: input, shape index: {}]   ;;  %s888_s1 = inlined_call_operand.vmem [shape: bf16[8,8,8], index: 1, kind: input, shape index: {}]   ;;  %s889_s2 = inlined_call_operand.vmem [shape: bf16[8,8,8], index: 2, kind: input, shape index: {}]   ;;  %s890_s3 = inlined_call_operand.vmem [shape: bf16[8,8,8], index: 3, kind: output, shape index: {0}]   ;;  %s891_s4 = inlined_call_operand.hbm [shape: f32[8,8,8], index: 4, kind: output, shape index: {1}]  }
   0x1   :  { %12 = vsyncpa [#allocation3 + $0x1], 0  ;;  %s764_s15 = smov 0   ;;  %s766_s16 = smov 0  }
   0x2   :  { %s768_s17 = smov 0   ;;  %s770_s18 = smov 0  }
   0x3   :  { %s772_s19 = smov 0   ;;  %s774_s20 = smov 0  }
   0x4 LB: > { %s568_s21 = sadd.s32 4294967295, %s735_s20   ;;  %s569_s22 = sadd.s32 4294967294, %s735_s20   ;;  %s735_s20 = sphi %s774_s20, %s18_s20   ;;  %s731_s19 = sphi %s772_s19, %s898_s19   ;;  %s727_s18 = sphi %s770_s18, %s897_s18   ;;  %s723_s17 = sphi %s768_s17, %s896_s17   ;;  %s719_s16 = sphi %s766_s16, %s895_s16   ;;  %s715_s15 = sphi %s764_s15, %s894_s15  }
   0x5   : > { %s30_s23 = sadd.s32 1, %s731_s19  ;;  %s147_s24 = sadd.s32 1, %s723_s17 }
   0x6   : > { %p32_p0 = scmp.ge.s32.totalorder %s30_s23, 4  ;;  %p157_p1 = scmp.ne.s32.totalorder %s723_s17, %s719_s16 }
   0x7   : > { %p158_p2 = scmp.eq.s32.totalorder %s568_s21, 3  ;;  %p163_p3 = scmp.ne.s32.totalorder %s719_s16, %s715_s15 }
   0x8   : > { %s900_s23 = smov (%p32_p0, %s30_s23), 0  ;;  %p164_p5 = scmp.eq.s32.totalorder %s569_s22, 3 }
   0x9   : > { %p804_p4 = por %p158_p2, %p157_p1  ;;  %s142_s26 = ssub.s32 %s731_s19, %s900_s23 }
   0xa   : > { %p572_p6 = scmp.ge.s32.totalorder %s735_s20, 1  ;;  %p145_p7 = scmp.eq.s32.totalorder %s142_s26, 0 }
   0xb   : > { %p811_p8 = por %p164_p5, %p163_p3  ;;  %p212_p9 = scmp.lt.s32.totalorder %s735_s20, 5 }
   0xc   : > { %s817_s28 = scalar_select %p145_p7, %s723_s17, %s147_s24  }
   0xd   : > { %p213_p10 = pnand %p572_p6, %p212_p9 }
   0xe   : > { %s574_s29 = sshll.u32 (!%p213_p10), %s727_s18, 1  ;;  %s256_s14 = sand.u32 (!%p213_p10), 1, %s719_s16  }
   0xf   : > { %216 = sbr.rel (%p213_p10) target bundleno = 564 (0x234), region = 32  ;;  %p260_p11 = scmp.lt.s32.totalorder (!%p213_p10), %s574_s29, 7 }
  0x10   : > { %s573_s21 = sshll.u32 (!%p213_p10), %s256_s14, 4  ;;  %s591_s24 = sshll.u32 (!%p213_p10), %s727_s18, 4 }
  0x11   : > { %s258_s22 = scalar_lea.vmem (!%p213_p10), [#allocation2], %s573_s21  ;;  %s433_s5 = scalar_lea.hbm (!%p213_p10), %s891_s4, %s591_s24 }
  0x12   : > { %s434_s6 = sshll.u32 (!%p213_p10), %s258_s22, 4  ;;  %s417_s8 = scalar_lea.sflag (!%p213_p10), [#allocation3], %s256_s14  ;;  %s435_s6 = int_to_ptr.vmem [resolvable:$true] %s434_s6 }
  0x13   : > { %s677_s18 = scalar_lea.hbm (!%p213_p10), %s891_s4, 64 }
  0x14   : > { %s902_s29 = smov (!%p260_p11, %s574_s29), 7  ;;  %vm297_vm0 = vcmask 64512   ;;  %vm367_vm1 = vcmask 1043456  }
  0x15   : > { %s820_s30 = sshll.u32 %s902_s29, 2 }
  0x16   : > { %s272_s7 = scalar_lea.vmem %s888_s1, %s820_s30  ;;  %s266_s10 = scalar_lea.vmem %s887_s0, %s820_s30 }
  0x17   : > { %v293_v0 = vld [vmem:[%s272_s7] sm:$0xf]  ;;  %v294_v1 = vld [vmem:[%s272_s7 + $0x4] sm:$0xf]  ;;  %s278_s13 = scalar_lea.vmem %s889_s2, %s820_s30  ;;  %s436_s7 = sshll.u32 %s433_s5, 4  ;;  %s437_s7 = int_to_ptr.hbm [resolvable:$true] %s436_s7 }
  0x18   : > { %v302_v2 = vsel %vm297_vm0, %v293_v0, 0  ;;  %v321_v3 = vsel %vm297_vm0, %v294_v1, 0  ;;  %v291_v4 = vld [vmem:[%s266_s10] sm:$0xf]  ;;  %v292_v5 = vld [vmem:[%s266_s10 + $0x4] sm:$0xf] }
  0x19   : > { %311 = vmatpush.bf16.xpose.msra.mxu0 %v302_v2  ;;  %330 = vmatpush.bf16.xpose.msra.mxu1 %v321_v3  ;;  %v295_v24 = vld [vmem:[%s278_s13] sm:$0xf]  ;;  %v296_v26 = vld [vmem:[%s278_s13 + $0x4] sm:$0xf]  ;;  %s671_s9 = sshra.s32 %s437_s7, 4  ;;  %s672_s9 = int_to_ptr.hbm [resolvable:$true] %s671_s9 }
  0x1a   : > { %v369_v25 = vsel %vm367_vm1, %v295_v24, 0  ;;  %v388_v27 = vsel %vm367_vm1, %v296_v26, 0  ;;  %s673_s10 = scalar_lea.hbm %s672_s9, 16  ;;  %p678_p1 = scmp.lt.s32.totalorder %s672_s9, %s891_s4 }
  0x1b   : > { %378 = vmatpush.bf16.msra.mxu2 %v369_v25  ;;  %397 = vmatpush.bf16.msra.mxu3 %v388_v27  ;;  %p674_p12 = scmp.ne.s32.totalorder %s672_s9, %s673_s10  ;;  %p679_p2 = scmp.lt.s32.totalorder %s677_s18, %s673_s10 }
  0x1d   : > { %p675_p13 = pnand %p674_p12, %p804_p4  ;;  %p680_p3 = por %p679_p2, %p678_p1 }
  0x1f   : > { %p676_p0 = pneg %p675_p13 }
  0x20   : > { %582 = vmatmul.msk.bf16.vlgmr.msra.gmra.mxu0 %vm297_vm0, %v291_v4  ;;  %583 = vmatmul.msk.bf16.vlgmr.msra.gmra.mxu1 %vm297_vm0, %v292_v5 }
  0x21   : > { %p681_p5 = pnand %p680_p3, %p676_p0 }
  0x9d   : > { %v313_v6 = vpop.f32.mrf.mxu0  ;;  %v332_v7 = vpop.f32.mrf.mxu1 }
  0x9e   : > { %v336_v8 = vmul.f32 0.35355338, %v313_v6  ;;  %v337_v10 = vmul.f32 0.35355338, %v332_v7 }
  0xa0   : > { %v338_v9 = vsel %vm297_vm0, %v336_v8, -inf  ;;  %v341_v13 = vsel %vm297_vm0, %v337_v10, -inf }
  0xa1   : > { %339 = vmax.xlane.f32.xlu0 %v338_v9 }
  0xa5   : > { %v315_v11 = vpop.f32.mrf.mxu0  ;;  %v334_v12 = vpop.f32.mrf.mxu1 }
  0xa9   : > { %342 = vmax.xlane.f32.xlu0 %v341_v13 }
 0x114   : > { %v340_v14 = vpop.xlane.xlu0 %339 }
 0x115   : > { %v344_v15 = vsub.f32 %v336_v8, %v340_v14 }
 0x117   : > { %v346_v16 = vmul.f32 1.442695, %v344_v15 }
 0x119   : > { %649 = vpow2.f32 %v346_v16 }
 0x11c   : > { %v343_v17 = vpop.xlane.xlu0 %342 }
 0x11d   : > { %v345_v18 = vsub.f32 %v337_v10, %v343_v17 }
 0x11f   : > { %v650_v19 = vpop.eup %649  ;;  %v348_v20 = vmul.f32 1.442695, %v345_v18 }
 0x120   : > { %v350_v21 = vsel %vm297_vm0, %v650_v19, 0.0 }
 0x121   : > { %651 = vpow2.f32 %v348_v20  ;;  %351 = vadd.xlane.f32.xlu1 %v350_v21 }
 0x127   : > { %v652_v22 = vpop.eup %651 }
 0x128   : > { %v353_v23 = vsel %vm297_vm0, %v652_v22, 0.0 }
 0x129   : > { %354 = vadd.xlane.f32.xlu1 %v353_v23 }
 0x194   : > { %v352_v28 = vpop.xlane.xlu1 %351 }
 0x195   : > { %653 = vrcp.f32 %v352_v28 }
 0x19b   : > { %v654_v29 = vpop.eup %653 }
 0x19c   : > { %v355_v30 = vpop.xlane.xlu1 %354  ;;  %v358_v31 = vmul.f32 %v654_v29, %v650_v19 }
 0x19d   : > { %655 = vrcp.f32 %v355_v30 }
 0x19e   : > { %360 = vst.msk [vmem:[%s258_s22] sm:$0xff] %vm297_vm0, %v358_v31  ;;  %v362_v32 = vpack.c.bf16 %v358_v31, %v358_v31 }
 0x1a0   : > { %584 = vmatmul.msk.bf16.vlgmr.msra.gmra.mxu2 %vm297_vm0, %v362_v32 }
 0x1a3   : > { %v656_v33 = vpop.eup %655 }
 0x1a4   : > { %v359_v34 = vmul.f32 %v656_v33, %v652_v22 }
 0x1a6   : > { %361 = vst.msk [vmem:[%s258_s22 + $0x8] sm:$0xff] %vm297_vm0, %v359_v34  ;;  %v363_v35 = vpack.c.bf16 %v359_v34, %v359_v34 }
 0x1a8   : > { %585 = vmatmul.msk.bf16.vlgmr.msra.gmra.mxu3 %vm297_vm0, %v363_v35 }
 0x1a9   : > { %684 = shalt.err (!%p681_p5)
}
 0x1aa   : > { %s737_s14 = smov 128   ;;  %s738_s22 = smov 8   ;;  %vm405_vm2 = vcmask 60416  }
 0x1ab   : > { %592 = dma.vmem_to_hbm [thread:$0]  (%p804_p4), %s435_s6, 256, %s437_s7, %s417_s8, %s737_s14, %s737_s14, %s738_s22  }
 0x1ac   : > { %s287_s29 = scalar_lea.vmem %s890_s3, %s820_s30 }
 0x223   : > { %v380_v36 = vpop.f32.mrf.mxu2 }
 0x224   : > { %v403_v37 = vpack.c.bf16 %v380_v36, %v380_v36 }
 0x226   : > { %406 = vst.msk [vmem:[%s287_s29] sm:$0xf] %vm405_vm2, %v403_v37 }
 0x22b   : > { %v382_v38 = vpop.f32.mrf.mxu2  ;;  %v399_v39 = vpop.f32.mrf.mxu3 }
 0x22c   : > { %v404_v40 = vpack.c.bf16 %v399_v39, %v399_v39 }
 0x22e   : > { %407 = vst.msk [vmem:[%s287_s29 + $0x4] sm:$0xf] %vm405_vm2, %v404_v40 }
 0x233   : > { %v401_v41 = vpop.f32.mrf.mxu3 }
 0x234 PF: > { %p598_p6 = scmp.ge.s32.totalorder %s735_s20, 2  ;;  %s462_s25 = sand.u32 1, %s715_s15  }
 0x235   : > { %s463_s5 = scalar_lea.sflag [#allocation3], %s462_s25 }
 0x236   : > { %p595_p4 = pnand %p598_p6, %p811_p8 }
 0x238   : > { %p596_p7 = pneg %p595_p4 }
 0x23a   : > { %710 = dma.done.wait (%p596_p7), %s463_s5, 256  }
 0x23b   : > { %712 = vsyncadd (%p596_p7), %s463_s5, 4294967040  ;;  %s18_s20 = sadd.s32 1, %s735_s20   ;;  %s894_s15 = smov %s719_s16 }
 0x23c   : > { %p15_p9 = scmp.ge.s32.totalorder %s18_s20, 6   ;;  %s895_s16 = smov %s723_s17 }
 0x23d   : > { %s896_s17 = smov %s817_s28  ;;  %s897_s18 = smov %s731_s19 }
 0x23e   : > { %s898_s19 = smov %s900_s23  ;;  %17 = sbr.rel (!%p15_p9) target bundleno = 4 (0x4), region = 85 }
 0x243   :  { %469 = vsyncpa [#allocation3], 1 }
 0x244   :  { %471 = vsyncpa [#allocation3 + $0x1], 1 }

// kernel: decoder_forward.23
= control target key start
LH: loop header
LB: loop body
LE: loop exit
PB: predicated region body
PF: predicated region fallthrough
CT: control target
= control target key end

     0   :  { %s737_s24 = smov 0   ;;  %s739_s25 = smov 0   ;;  %s813_s0 = inlined_call_operand.vmem [shape: f32[16,32], index: 0, kind: input, shape index: {}]   ;;  %s814_s1 = inlined_call_operand.vmem [shape: bf16[32,64], index: 1, kind: input, shape index: {}]   ;;  %s815_s2 = inlined_call_operand.vmem [shape: f32[1,64], index: 2, kind: input, shape index: {}]   ;;  %s816_s3 = inlined_call_operand.vmem [shape: bf16[64,32], index: 3, kind: input, shape index: {}]   ;;  %s817_s4 = inlined_call_operand.vmem [shape: f32[1,32], index: 4, kind: input, shape index: {}]   ;;  %s818_s5 = inlined_call_operand.vmem [shape: f32[1,32], index: 5, kind: input, shape index: {}]   ;;  %s819_s6 = inlined_call_operand.vmem [shape: f32[1,32], index: 6, kind: input, shape index: {}]   ;;  %s820_s7 = inlined_call_operand.vmem [shape: f32[16,32], index: 7, kind: output, shape index: {}]  }
   0x1   :  { %s741_s26 = smov 0  }
   0x2 LB: > { %s29_s27 = sadd.s32 1, %s689_s25  ;;  %p600_p0 = scmp.ge.s32.totalorder %s693_s26, 1  ;;  %s693_s26 = sphi %s741_s26, %s17_s26   ;;  %s689_s25 = sphi %s739_s25, %s822_s25   ;;  %s685_s24 = sphi %s737_s24, %s821_s24  }
   0x3   : > { %p31_p1 = scmp.ge.s32.totalorder %s29_s27, 2  ;;  %p276_p2 = scmp.lt.s32.totalorder %s693_s26, 3 }
   0x5   : > { %s824_s27 = smov (%p31_p1, %s29_s27), 0  ;;  %p277_p3 = pnand %p600_p0, %p276_p2 }
   0x6   : > { %p318_p4 = scmp.lt.s32.totalorder (!%p277_p3), %s685_s24, 1 }
   0x7   : > { %280 = sbr.rel (%p277_p3) target bundleno = 561 (0x231), region = 48 }
   0xc   : > { %v632_v0 = vld [vmem:[%s814_s1 + $0x8] sm:$0xff]  ;;  %v636_v1 = vld [vmem:[%s816_s3 + $0x18] sm:$0xff]  ;;  %v631_v2 = vld [vmem:[%s814_s1] sm:$0xff]  ;;  %s826_s24 = smov (!%p318_p4, %s685_s24), 1  ;;  %vm344_vm0 = vcmask 261120   ;;  %v695_v8 = vmov 0.0  }
   0xd   : > { %378 = vmatpush.bf16.msra.mxu0 %v632_v0  ;;  %428 = vmatpush.bf16.msra.mxu1 %v636_v1  ;;  %v635_v3 = vld [vmem:[%s816_s3 + $0x10] sm:$0xff]  ;;  %s601_s13 = sshll.u32 %s826_s24, 3  ;;  %v634_v6 = vld [vmem:[%s816_s3 + $0x8] sm:$0xff]  ;;  %v633_v7 = vld [vmem:[%s816_s3] sm:$0xff]  ;;  %345 = vst.msk [vmem:[#allocation2] sm:$0xff] %vm344_vm0, %v695_v8  ;;  %vm420_vm1 = vcmask 523264  }
   0xe   : > { %s321_s16 = scalar_lea.vmem %s813_s0, %s601_s13  ;;  %v663_v9 = vld [vmem:[%s815_s2] ss:$0 sm:$0xff]  ;;  %v696_v24 = vmov 32.0   ;;  %s338_s12 = scalar_lea.vmem %s820_s7, %s601_s13 }
   0xf   : > { %v346_v4 = vld [vmem:[%s321_s16] sm:$0xff]  ;;  %667 = vrcp.f32 %v696_v24 }
  0x10   : > { %v347_v5 = vpack.c.bf16 %v346_v4, %v346_v4  ;;  %v664_v19 = vld [vmem:[%s817_s4] ss:$0 sm:$0xff] }
  0x11   : > { %379 = vmatpush.bf16.msra.mxu0 %v631_v2  ;;  %429 = vmatpush.bf16.msra.mxu1 %v635_v3  ;;  %v665_v45 = vld [vmem:[%s818_s5] ss:$0 sm:$0xff] }
  0x12   : > { %v666_v47 = vld [vmem:[%s819_s6] ss:$0 sm:$0xff] }
  0x14   : > { %611 = vmatmul.msk.bf16.vlgmr.msra.gmra.mxu0 %vm344_vm0, %v347_v5  ;;  %v386_v15 = vld [vmem:[#allocation2] sm:$0xff] }
  0x15   : > { %430 = vmatpush.bf16.msra.mxu1 %v634_v6  ;;  %v668_v25 = vpop.eup %667 }
  0x16   : > { %v455_v26 = vmul.f32 32.0, %v668_v25  ;;  %vm459_vm2 = vweird.f32 %v668_v25 }
  0x18   : > { %v456_v27 = vsub.f32 1.0, %v455_v26 }
  0x19   : > { %431 = vmatpush.bf16.msra.mxu1 %v633_v7 }
  0x1a   : > { %v457_v28 = vmul.f32 %v668_v25, %v456_v27 }
  0x1c   : > { %v458_v29 = vadd.f32 %v668_v25, %v457_v28 }
  0x1e   : > { %v460_v30 = vsel %vm459_vm2, %v668_v25, %v458_v29 }
  0x91   : > { %v381_v10 = vpop.f32.mrf.mxu0 }
  0x92   : > { %v382_v11 = vadd.f32 %v663_v9, %v381_v10 }
  0x94   : > { %v385_v12 = vmax.f32 %v382_v11, 0.0 }
  0x96   : > { %v387_v13 = vpack.c.bf16 %v385_v12, %v385_v12 }
  0x98   : > { %628 = vmatmul.msk.bf16.vlgmr.msra.gmra.mxu1 %vm420_vm1, %v387_v13 }
  0x99   : > { %v383_v14 = vpop.f32.mrf.mxu0 }
 0x115   : > { %v433_v16 = vpop.f32.mrf.mxu1 }
 0x116   : > { %v437_v17 = vadd.f32 %v433_v16, %v386_v15 }
 0x118   : > { %438 = vst.msk [vmem:[#allocation2] sm:$0xff] %vm344_vm0, %v437_v17 }
 0x11d   : > { %v435_v18 = vpop.f32.mrf.mxu1 }
 0x11f   : > { %v442_v20 = vld [vmem:[#allocation2] sm:$0xff] }
 0x120   : > { %v443_v21 = vadd.f32 %v442_v20, %v346_v4 }
 0x122   : > { %v448_v22 = vadd.f32 %v664_v19, %v443_v21 }
 0x124   : > { %v451_v23 = vsel %vm344_vm0, %v448_v22, 0.0 }
 0x125   : > { %452 = vadd.xlane.f32.xlu0 %v451_v23 }
 0x198   : > { %v453_v31 = vpop.xlane.xlu0 %452 }
 0x199   : > { %v461_v32 = vmul.f32 %v460_v30, %v453_v31 }
 0x19b   : > { %v462_v33 = vsub.f32 %v448_v22, %v461_v32 }
 0x19d   : > { %v463_v34 = vmul.f32 %v462_v33, %v462_v33 }
 0x19f   : > { %v464_v35 = vsel %vm344_vm0, %v463_v34, 0.0 }
 0x1a0   : > { %465 = vadd.xlane.f32.xlu0 %v464_v35 }
 0x213   : > { %v466_v36 = vpop.xlane.xlu0 %465 }
 0x214   : > { %v467_v37 = vmul.f32 %v466_v36, %v460_v30 }
 0x216   : > { %v468_v38 = vadd.f32 1e-05, %v467_v37 }
 0x218   : > { %669 = vrsqrt.f32 %v468_v38  ;;  %vm475_vm4 = vweird.f32 %v468_v38 }
 0x21e   : > { %v670_v39 = vpop.eup %669 }
 0x21f   : > { %v470_v40 = vmul.f32 %v670_v39, %v468_v38  ;;  %vm476_vm3 = vweird.f32 %v670_v39 }
 0x220   : > { %vm477_vm5 = vmor %vm475_vm4, %vm476_vm3 }
 0x221   : > { %v471_v41 = vmul.f32 %v670_v39, %v470_v40 }
 0x223   : > { %v472_v42 = vmul.f32 0.5, %v471_v41 }
 0x225   : > { %v473_v43 = vsub.f32 1.5, %v472_v42 }
 0x227   : > { %v474_v44 = vmul.f32 %v670_v39, %v473_v43 }
 0x229   : > { %v478_v46 = vsel %vm477_vm5, %v670_v39, %v474_v44 }
 0x22a   : > { %v479_v48 = vmul.f32 %v478_v46, %v462_v33 }
 0x22c   : > { %v483_v49 = vmul.f32 %v665_v45, %v479_v48 }
 0x22e   : > { %v487_v50 = vadd.f32 %v666_v47, %v483_v49 }
 0x230   : > { %488 = vst.msk [vmem:[%s338_s12] sm:$0xff] %vm344_vm0, %v487_v50 }
 0x231 PF: > { %s17_s26 = sadd.s32 1, %s693_s26   ;;  %s821_s24 = smov %s689_s25 }
 0x232   : > { %p14_p5 = scmp.ge.s32.totalorder %s17_s26, 4   ;;  %s822_s25 = smov %s824_s27 }
 0x234   :  { %16 = sbr.rel (!%p14_p5) target bundleno = 2 (0x2), region = 95 }

// kernel: decoder_forward.31
= control target key start
LH: loop header
LB: loop body
LE: loop exit
PB: predicated region body
PF: predicated region fallthrough
CT: control target
= control target key end

     0   :  { %12 = vsyncpa [#allocation4], 0  ;;  %s980_s0 = inlined_call_operand.vmem [shape: f32[16,32], index: 0, kind: input, shape index: {}]   ;;  %s981_s1 = inlined_call_operand.vmem [shape: bf16[32,64], index: 1, kind: input, shape index: {}]   ;;  %s982_s2 = inlined_call_operand.vmem [shape: f32[1,64], index: 2, kind: input, shape index: {}]   ;;  %s983_s3 = inlined_call_operand.vmem [shape: bf16[64,32], index: 3, kind: input, shape index: {}]   ;;  %s984_s4 = inlined_call_operand.vmem [shape: f32[1,32], index: 4, kind: input, shape index: {}]   ;;  %s985_s5 = inlined_call_operand.vmem [shape: f32[1,32], index: 5, kind: input, shape index: {}]   ;;  %s986_s6 = inlined_call_operand.vmem [shape: f32[1,32], index: 6, kind: input, shape index: {}]   ;;  %s987_s7 = inlined_call_operand.hbm [shape: f32[16,32], index: 7, kind: output, shape index: {}]  }
   0x1   :  { %14 = vsyncpa [#allocation4 + $0x1], 0  ;;  %s847_s24 = smov 0   ;;  %s849_s25 = smov 0  }
   0x2   :  { %s851_s26 = smov 0   ;;  %s853_s27 = smov 0  }
   0x3   :  { %s855_s28 = smov 0   ;;  %s857_s29 = smov 0  }
   0x4 LB: > { %s614_s30 = sadd.s32 4294967295, %s803_s29   ;;  %s615_s8 = sadd.s32 4294967294, %s803_s29   ;;  %s803_s29 = sphi %s857_s29, %s20_s29   ;;  %s799_s28 = sphi %s855_s28, %s994_s28   ;;  %s795_s27 = sphi %s853_s27, %s993_s27   ;;  %s791_s26 = sphi %s851_s26, %s992_s26   ;;  %s787_s25 = sphi %s849_s25, %s991_s25   ;;  %s783_s24 = sphi %s847_s24, %s990_s24  }
   0x5   : > { %s32_s9 = sadd.s32 1, %s799_s28  ;;  %s206_s10 = sadd.s32 1, %s791_s26 }
   0x6   : > { %p34_p0 = scmp.ge.s32.totalorder %s32_s9, 2  ;;  %p216_p1 = scmp.ne.s32.totalorder %s791_s26, %s787_s25 }
   0x7   : > { %p217_p2 = scmp.eq.s32.totalorder %s614_s30, 1  ;;  %p222_p3 = scmp.ne.s32.totalorder %s787_s25, %s783_s24 }
   0x8   : > { %s996_s9 = smov (%p34_p0, %s32_s9), 0  ;;  %p223_p5 = scmp.eq.s32.totalorder %s615_s8, 1 }
   0x9   : > { %p887_p4 = por %p217_p2, %p216_p1  ;;  %s203_s12 = ssub.s32 %s799_s28, %s996_s9 }
   0xa   : > { %p621_p6 = scmp.ge.s32.totalorder %s803_s29, 1  ;;  %p204_p7 = scmp.eq.s32.totalorder %s203_s12, 0 }
   0xb   : > { %p894_p8 = por %p223_p5, %p222_p3  ;;  %p279_p9 = scmp.lt.s32.totalorder %s803_s29, 3 }
   0xc   : > { %s900_s14 = scalar_select %p204_p7, %s791_s26, %s206_s10  }
   0xd   : > { %p280_p10 = pnand %p621_p6, %p279_p9 }
   0xe   : > { %p322_p11 = scmp.lt.s32.totalorder (!%p280_p10), %s795_s27, 1  ;;  %s319_s23 = sand.u32 (!%p280_p10), 1, %s787_s25  }
   0xf   : > { %283 = sbr.rel (%p280_p10) target bundleno = 571 (0x23b), region = 48  ;;  %s651_s8 = sshll.u32 (!%p280_p10), %s795_s27, 3 }
  0x10   : > { %s500_s17 = scalar_lea.hbm (!%p280_p10), %s987_s7, %s651_s8  ;;  %s490_s22 = scalar_lea.sflag (!%p280_p10), [#allocation4], %s319_s23 }
  0x14   : > { %v655_v0 = vld [vmem:[%s981_s1 + $0x8] sm:$0xff]  ;;  %v659_v1 = vld [vmem:[%s983_s3 + $0x18] sm:$0xff]  ;;  %v654_v2 = vld [vmem:[%s981_s1] sm:$0xff]  ;;  %s323_s21 = scalar_select %p322_p11, %s795_s27, 1  ;;  %vm344_vm0 = vcmask 261120   ;;  %v805_v8 = vmov 0.0  }
  0x15   : > { %378 = vmatpush.bf16.msra.mxu0 %v655_v0  ;;  %428 = vmatpush.bf16.msra.mxu1 %v659_v1  ;;  %v658_v3 = vld [vmem:[%s983_s3 + $0x10] sm:$0xff]  ;;  %v657_v6 = vld [vmem:[%s983_s3 + $0x8] sm:$0xff]  ;;  %v656_v7 = vld [vmem:[%s983_s3] sm:$0xff]  ;;  %345 = vst.msk [vmem:[#allocation2] sm:$0xff] %vm344_vm0, %v805_v8  ;;  %vm420_vm1 = vcmask 523264   ;;  %v806_v24 = vmov 32.0  }
  0x16   : > { %s623_s30 = sshll.u32 %s323_s21, 3  ;;  %v717_v9 = vld [vmem:[%s982_s2] ss:$0 sm:$0xff]  ;;  %721 = vrcp.f32 %v806_v24  ;;  %s504_s21 = sshll.u32 %s500_s17, 4  ;;  %s505_s21 = int_to_ptr.hbm [resolvable:$true] %s504_s21 }
  0x17   : > { %s325_s12 = scalar_lea.vmem %s980_s0, %s623_s30  ;;  %v718_v19 = vld [vmem:[%s984_s4] ss:$0 sm:$0xff]  ;;  %s622_s30 = sshll.u32 %s319_s23, 3 }
  0x18   : > { %v346_v4 = vld [vmem:[%s325_s12] sm:$0xff]  ;;  %s321_s20 = scalar_lea.vmem [#allocation3], %s622_s30  ;;  %s739_s10 = sshra.s32 %s505_s21, 4  ;;  %s740_s10 = int_to_ptr.hbm [resolvable:$true] %s739_s10 }
  0x19   : > { %379 = vmatpush.bf16.msra.mxu0 %v654_v2  ;;  %429 = vmatpush.bf16.msra.mxu1 %v658_v3  ;;  %v347_v5 = vpack.c.bf16 %v346_v4, %v346_v4  ;;  %v719_v45 = vld [vmem:[%s985_s5] ss:$0 sm:$0xff]  ;;  %s502_s27 = sshll.u32 %s321_s20, 4  ;;  %s741_s8 = scalar_lea.hbm %s740_s10, 8  ;;  %s503_s27 = int_to_ptr.vmem [resolvable:$true] %s502_s27 }
  0x1a   : > { %v720_v48 = vld [vmem:[%s986_s6] ss:$0 sm:$0xff]  ;;  %p742_p12 = scmp.ne.s32.totalorder %s740_s10, %s741_s8  ;;  %s745_s30 = scalar_lea.hbm %s987_s7, 16 }
  0x1b   : > { %p746_p1 = scmp.lt.s32.totalorder %s740_s10, %s987_s7  ;;  %p747_p2 = scmp.lt.s32.totalorder %s745_s30, %s741_s8 }
  0x1c   : > { %632 = vmatmul.msk.bf16.vlgmr.msra.gmra.mxu0 %vm344_vm0, %v347_v5  ;;  %v386_v15 = vld [vmem:[#allocation2] sm:$0xff]  ;;  %v722_v25 = vpop.eup %721  ;;  %p743_p13 = pnand %p742_p12, %p887_p4 }
  0x1d   : > { %430 = vmatpush.bf16.msra.mxu1 %v657_v6  ;;  %v455_v26 = vmul.f32 32.0, %v722_v25  ;;  %vm459_vm2 = vweird.f32 %v722_v25  ;;  %p748_p3 = por %p747_p2, %p746_p1 }
  0x1e   : > { %p744_p0 = pneg %p743_p13 }
  0x1f   : > { %v456_v27 = vsub.f32 1.0, %v455_v26 }
  0x20   : > { %p749_p5 = pnand %p748_p3, %p744_p0 }
  0x21   : > { %431 = vmatpush.bf16.msra.mxu1 %v656_v7  ;;  %v457_v28 = vmul.f32 %v722_v25, %v456_v27 }
  0x23   : > { %v458_v29 = vadd.f32 %v722_v25, %v457_v28 }
  0x25   : > { %v460_v30 = vsel %vm459_vm2, %v722_v25, %v458_v29 }
  0x99   : > { %v381_v10 = vpop.f32.mrf.mxu0 }
  0x9a   : > { %v382_v11 = vadd.f32 %v717_v9, %v381_v10 }
  0x9c   : > { %v385_v12 = vmax.f32 %v382_v11, 0.0 }
  0x9e   : > { %v387_v13 = vpack.c.bf16 %v385_v12, %v385_v12 }
  0xa0   : > { %649 = vmatmul.msk.bf16.vlgmr.msra.gmra.mxu1 %vm420_vm1, %v387_v13 }
  0xa1   : > { %v383_v14 = vpop.f32.mrf.mxu0 }
 0x11d   : > { %v433_v16 = vpop.f32.mrf.mxu1 }
 0x11e   : > { %v437_v17 = vadd.f32 %v433_v16, %v386_v15 }
 0x120   : > { %438 = vst.msk [vmem:[#allocation2] sm:$0xff] %vm344_vm0, %v437_v17 }
 0x125   : > { %v435_v18 = vpop.f32.mrf.mxu1 }
 0x127   : > { %v442_v20 = vld [vmem:[#allocation2] sm:$0xff] }
 0x128   : > { %v443_v21 = vadd.f32 %v442_v20, %v346_v4 }
 0x12a   : > { %v448_v22 = vadd.f32 %v718_v19, %v443_v21 }
 0x12c   : > { %v451_v23 = vsel %vm344_vm0, %v448_v22, 0.0 }
 0x12d   : > { %452 = vadd.xlane.f32.xlu0 %v451_v23 }
 0x1a0   : > { %v453_v31 = vpop.xlane.xlu0 %452 }
 0x1a1   : > { %v461_v32 = vmul.f32 %v460_v30, %v453_v31 }
 0x1a3   : > { %v462_v33 = vsub.f32 %v448_v22, %v461_v32 }
 0x1a5   : > { %v463_v34 = vmul.f32 %v462_v33, %v462_v33 }
 0x1a7   : > { %v464_v35 = vsel %vm344_vm0, %v463_v34, 0.0 }
 0x1a8   : > { %465 = vadd.xlane.f32.xlu0 %v464_v35 }
 0x21b   : > { %v466_v36 = vpop.xlane.xlu0 %465 }
 0x21c   : > { %v467_v37 = vmul.f32 %v466_v36, %v460_v30 }
 0x21e   : > { %v468_v38 = vadd.f32 1e-05, %v467_v37 }
 0x220   : > { %723 = vrsqrt.f32 %v468_v38  ;;  %vm475_vm4 = vweird.f32 %v468_v38 }
 0x226   : > { %v724_v39 = vpop.eup %723 }
 0x227   : > { %v470_v40 = vmul.f32 %v724_v39, %v468_v38  ;;  %vm476_vm3 = vweird.f32 %v724_v39 }
 0x228   : > { %vm477_vm5 = vmor %vm475_vm4, %vm476_vm3 }
 0x229   : > { %v471_v41 = vmul.f32 %v724_v39, %v470_v40 }
 0x22b   : > { %v472_v42 = vmul.f32 0.5, %v471_v41 }
 0x22d   : > { %v473_v43 = vsub.f32 1.5, %v472_v42 }
 0x22f   : > { %v474_v44 = vmul.f32 %v724_v39, %v473_v43 }
 0x231   : > { %v478_v46 = vsel %vm477_vm5, %v724_v39, %v474_v44 }
 0x232   : > { %v479_v47 = vmul.f32 %v478_v46, %v462_v33 }
 0x234   : > { %v483_v49 = vmul.f32 %v719_v45, %v479_v47 }
 0x236   : > { %v487_v50 = vadd.f32 %v720_v48, %v483_v49 }
 0x238   : > { %488 = vst.msk [vmem:[%s321_s20] sm:$0xff] %vm344_vm0, %v487_v50 }
 0x239   : > { %752 = shalt.err (!%p749_p5)
}
 0x23a   : > { %660 = dma.vmem_to_hbm [thread:$0]  (%p887_p4), %s503_s27, 128, %s505_s21, %s490_s22  }
 0x23b PF: > { %p666_p6 = scmp.ge.s32.totalorder %s803_s29, 2  ;;  %s516_s23 = sand.u32 1, %s783_s24  }
 0x23c   : > { %s517_s18 = scalar_lea.sflag [#allocation4], %s516_s23 }
 0x23d   : > { %p663_p7 = pnand %p666_p6, %p894_p8 }
 0x23f   : > { %p664_p9 = pneg %p663_p7 }
 0x241   : > { %778 = dma.done.wait (%p664_p9), %s517_s18, 128  }
 0x242   : > { %780 = vsyncadd (%p664_p9), %s517_s18, 4294967168  ;;  %s20_s29 = sadd.s32 1, %s803_s29   ;;  %s990_s24 = smov %s787_s25 }
 0x243   : > { %p17_p10 = scmp.ge.s32.totalorder %s20_s29, 4   ;;  %s991_s25 = smov %s791_s26 }
 0x244   : > { %s992_s26 = smov %s900_s14  ;;  %s993_s27 = smov %s799_s28 }
 0x245   : > { %s994_s28 = smov %s996_s9  ;;  %19 = sbr.rel (!%p17_p10) target bundleno = 4 (0x4), region = 100 }
 0x24a   :  { %523 = vsyncpa [#allocation4], 1 }
 0x24b   :  { %525 = vsyncpa [#allocation4 + $0x1], 1 }

</bundles_post_ra>
